<compile_context>
chip_gen: v5e
topology: v5e:2x2
jax: 0.10.0
libtpu: 0.0.40
codegen_flags: <defaults>
</compile_context>

<pallas_src>
from math import floor

import numpy as np
import jax
import jax.numpy as jnp
from jax.experimental import pallas as pl
from jax.experimental.pallas import tpu as pltpu


# ----------------------------------------------------------------------------
# Glue helpers (filter shape, centered padding, DFT operands)
# ----------------------------------------------------------------------------
def _round_up(x, m):
    return ((x + m - 1) // m) * m


def _get_filter_shape(input_shape, filter_scale=2):
    # input_shape: (B, C, *spatial)
    nchannels = input_shape[1]
    fs = []
    for d in input_shape[2:]:
        f = int(filter_scale * d)
        if f % 2 == 0:
            f -= 1
        fs.append(f)
    return [nchannels] + fs


def _pad_signal(x, target_spatial):
    pads = [(0, 0), (0, 0)]
    for i, t in enumerate(target_spatial):
        cur = x.shape[2 + i]
        p1 = floor((t - cur) / 2)
        pads.append((p1, t - cur - p1))
    # NOTE: the loss is exactly invariant to the common spatial shift of this
    # padding (phases cancel in Fx * conj(Fy)), so torch's reversed pad order
    # gives the same value.
    return jnp.pad(x, pads)


def _dft_mats(n):
    k = np.arange(n)
    ang = 2.0 * np.pi * np.outer(k, k) / n
    # D[j,k] = exp(-2*pi*i*j*k/n) = cos(ang) - i*sin(ang)
    return np.cos(ang).astype(np.float32), (-np.sin(ang)).astype(np.float32)


def _build_dft_operands(Hf, Wf, Hc):
    """Fused DFT operands:
       DH  (2*Hc, Hf) : [DrH ; 0 ; DiH ; 0]  (DiH starts at sublane-aligned Hc)
       DW2 (2*Wf, 4*Wf): blockdiag([DrW|DiW], [DrW|DiW]) so one matmul
                         transforms the target|recon lane-concatenated slab.
    """
    drh, dih = _dft_mats(Hf)
    drw, diw = _dft_mats(Wf)
    dh = np.zeros((2 * Hc, Hf), np.float32)
    dh[:Hf, :] = drh
    dh[Hc:Hc + Hf, :] = dih
    dw2 = np.zeros((2 * Wf, 4 * Wf), np.float32)
    dw2[:Wf, 0:Wf] = drw
    dw2[:Wf, Wf:2 * Wf] = diw
    dw2[Wf:, 2 * Wf:3 * Wf] = drw
    dw2[Wf:, 3 * Wf:4 * Wf] = diw
    return jnp.asarray(dh), jnp.asarray(dw2)


# ----------------------------------------------------------------------------
# In-kernel helpers
# ----------------------------------------------------------------------------
def _image_spectra(A, DH, n, Hp, Hc, Hf, Wf):
    """Fx, Fy spectra of image n from the batched right-transform A.

    A  : (n_tile*Hp, 4*Wf) rows of image n hold [Zx*DrW | Zx*DiW | Zy*DrW | Zy*DiW]
    DH : (2*Hc, Hf)        [DrH ; DiH] (padded to aligned sublane offsets)
    """
    an = A[n * Hp:n * Hp + Hf, :]                                  # (Hf, 4Wf)
    hn = jnp.dot(DH, an, preferred_element_type=jnp.float32)       # (2Hc, 4Wf)
    t = hn[:Hf, :]            # DrH @ [...]
    b = hn[Hc:Hc + Hf, :]     # DiH @ [...]
    fxr = t[:, 0:Wf] - b[:, Wf:2 * Wf]
    fxi = t[:, Wf:2 * Wf] + b[:, 0:Wf]
    fyr = t[:, 2 * Wf:3 * Wf] - b[:, 3 * Wf:4 * Wf]
    fyi = t[:, 3 * Wf:4 * Wf] + b[:, 2 * Wf:3 * Wf]
    return fxr, fxi, fyr, fyi


def _scalar_tile(val):
    """Place a scalar at [0,0] of a lane-dense (8,128) output tile."""
    sub = jax.lax.broadcasted_iota(jnp.int32, (8, 128), 0)
    lane = jax.lax.broadcasted_iota(jnp.int32, (8, 128), 1)
    return jnp.where((sub == 0) & (lane == 0), val, jnp.float32(0.0))


# ----------------------------------------------------------------------------
# Pass 1: per-block partial sum of |Fcc|^2  (for the global RMS)
# ----------------------------------------------------------------------------
def _make_pass1_kernel(n_tile, Hp, Hc, Hf, Wf):
    def kernel(xy_ref, dh_ref, dw2_ref, out_ref):
        # one batched right-transform for the whole block (target|recon fused)
        A = jnp.dot(xy_ref[...], dw2_ref[...], preferred_element_type=jnp.float32)
        DH = dh_ref[...]
        ssum = jnp.float32(0.0)
        for n in range(n_tile):                      # small, unrolled
            fxr, fxi, fyr, fyi = _image_spectra(A, DH, n, Hp, Hc, Hf, Wf)
            ccr = fxr * fyr + fxi * fyi              # Re(Fx conj(Fy))
            cci = fxi * fyr - fxr * fyi              # Im(Fx conj(Fy))
            ssum = ssum + jnp.sum(ccr * ccr + cci * cci)
        out_ref[...] = _scalar_tile(ssum)
    return kernel


# ----------------------------------------------------------------------------
# Pass 2: Wiener filter + penalty norm, per-block partial loss
# ----------------------------------------------------------------------------
def _make_pass2_kernel(n_tile, Hp, Hc, Hf, Wf, n_images):
    inv_hw = 1.0 / float(Hf * Wf)

    def kernel(c_ref, xy_ref, dh_ref, dw2_ref, out_ref):
        c = c_ref[0]                                 # lmbda * rms^2 (SMEM scalar)
        A = jnp.dot(xy_ref[...], dw2_ref[...], preferred_element_type=jnp.float32)
        DH = dh_ref[...]
        base = pl.program_id(0) * n_tile
        total = jnp.float32(0.0)
        for n in range(n_tile):                      # small, unrolled
            fxr, fxi, fyr, fyi = _image_spectra(A, DH, n, Hp, Hc, Hf, Wf)
            ccr = fxr * fyr + fxi * fyi
            cci = fxi * fyr - fxr * fyi
            ac = fxr * fxr + fxi * fxi               # |Fx|^2 (real)
            # Fd = (Fcc + c) / (Fac + c)   (corr_norm + lmbda folded into c)
            den = ac + c
            inv0 = pl.reciprocal(den, approx=True)   # EUP slot
            inv_den = inv0 * (2.0 - den * inv0)      # one Newton step -> f32 accurate
            fdr = (ccr + c) * inv_den
            fdi = cci * inv_den
            # Parseval + dirac-at-origin:
            #   ||v - delta||^2 = (sum|Fd|^2 - 2*sum(Re Fd))/(Hf*Wf) + 1
            s2 = jnp.sum(fdr * fdr + fdi * fdi)
            s1 = jnp.sum(fdr)
            nrm2 = jnp.maximum((s2 - 2.0 * s1) * inv_hw + 1.0, 0.0)
            loss_n = 0.5 * jnp.sqrt(nrm2)
            # mask out images that only exist because of block padding
            total = total + jnp.where(base + n < n_images, loss_n, 0.0)
        out_ref[...] = _scalar_tile(total)
    return kernel


# ----------------------------------------------------------------------------
# Wrapper
# ----------------------------------------------------------------------------
def wiener_loss(recon, target, lmbda=1e-4, reduction="mean", n_tile=None):
    """Pallas implementation of WienerLoss.forward with default settings."""
    assert recon.shape == target.shape
    assert recon.ndim == 4, "this port handles NCHW (2-D spatial) inputs"
    B, C = recon.shape[:2]
    fshape = _get_filter_shape(recon.shape)          # [C, Hf, Wf]
    Hf, Wf = fshape[1], fshape[2]
    Hp = _round_up(Hf, 8)        # per-image sublane slot (aligned in-kernel slices)
    Hc = Hp                      # row offset of DiH inside the fused DH operand

    N = B * C
    if n_tile is None:
        # >=2 grid steps whenever possible so the "parallel" axis can use both
        # v7x TensorCores; keep blocks modest so they also fit 64 MiB VMEM parts.
        n_tile = max(1, min(8, -(-N // 2)))
    n_tile = min(n_tile, N)
    num_blocks = pl.cdiv(N, n_tile)
    N_pad = num_blocks * n_tile

    # pad to filter shape, stack (B,C)->N, lane-concat target|recon per image.
    tgt = _pad_signal(target.astype(jnp.float32), (Hf, Wf)).reshape(N, Hf, Wf)
    rec = _pad_signal(recon.astype(jnp.float32), (Hf, Wf)).reshape(N, Hf, Wf)
    xy = jnp.concatenate([tgt, rec], axis=-1)                  # mode='reverse': x=target
    xy = jnp.pad(xy, ((0, N_pad - N), (0, Hp - Hf), (0, 0)))   # zero rows / images
    xy = xy.reshape(N_pad * Hp, 2 * Wf)

    dh, dw2 = _build_dft_operands(Hf, Wf, Hc)

    sig_block = (n_tile * Hp, 2 * Wf)
    out_shape = jax.ShapeDtypeStruct((num_blocks * 8, 128), jnp.float32)

    # explicit VMEM budget: double-buffered input block + operands + intermediates
    est = (2 * (n_tile * Hp * 2 * Wf) + 2 * (2 * Hc * Hf + 2 * Wf * 4 * Wf)
           + 2 * (n_tile * Hp * 4 * Wf) + 16 * Hf * Wf + 4 * 8 * 128) * 4
    vmem_limit = int(min(48 * 2 ** 20, max(8 * 2 ** 20, 4 * est)))
    cparams = pltpu.CompilerParams(dimension_semantics=("parallel",),
                                   vmem_limit_bytes=vmem_limit)

    mm_flops = num_blocks * (2 * (n_tile * Hp) * (2 * Wf) * (4 * Wf)
                             + n_tile * 2 * (2 * Hc) * Hf * (4 * Wf))
    ew = num_blocks * n_tile * Hf * Wf
    bytes_acc = int(xy.size * 4 + num_blocks * (dh.size + dw2.size) * 4
                    + num_blocks * 8 * 128 * 4)
    cost1 = pl.CostEstimate(flops=int(mm_flops + 10 * ew), transcendentals=0,
                            bytes_accessed=bytes_acc)
    cost2 = pl.CostEstimate(flops=int(mm_flops + 24 * ew),
                            transcendentals=int(ew + 8 * num_blocks * n_tile),
                            bytes_accessed=bytes_acc)

    # ---- pass 1: partial sums of |Fcc|^2 --------------------------------
    p1 = pl.pallas_call(
        _make_pass1_kernel(n_tile, Hp, Hc, Hf, Wf),
        out_shape=out_shape,
        grid=(num_blocks,),
        in_specs=[pl.BlockSpec(sig_block, lambda i: (i, 0)),
                  pl.BlockSpec((2 * Hc, Hf), lambda i: (0, 0)),
                  pl.BlockSpec((2 * Wf, 4 * Wf), lambda i: (0, 0))],
        out_specs=pl.BlockSpec((8, 128), lambda i: (i, 0)),
        compiler_params=cparams,
        cost_estimate=cost1,
    )(xy, dh, dw2)

    ssum = jnp.sum(p1)
    # corr_norm=True + lmbda fold into a single scalar: c = lmbda * rms^2
    c = (jnp.float32(lmbda) * ssum / jnp.float32(N * Hf * Wf)).reshape(1)

    # ---- pass 2: Wiener filter + loss (spectra recomputed, not spilled) --
    gs2 = pltpu.PrefetchScalarGridSpec(
        num_scalar_prefetch=1,
        grid=(num_blocks,),
        in_specs=[pl.BlockSpec(sig_block, lambda i, s: (i, 0)),
                  pl.BlockSpec((2 * Hc, Hf), lambda i, s: (0, 0)),
                  pl.BlockSpec((2 * Wf, 4 * Wf), lambda i, s: (0, 0))],
        out_specs=pl.BlockSpec((8, 128), lambda i, s: (i, 0)),
    )
    p2 = pl.pallas_call(
        _make_pass2_kernel(n_tile, Hp, Hc, Hf, Wf, N),
        out_shape=out_shape,
        grid_spec=gs2,
        compiler_params=cparams,
        cost_estimate=cost2,
    )(c, xy, dh, dw2)

    total = jnp.sum(p2)
    if reduction == "mean":
        return total / jnp.float32(N)
    return total


# ----------------------------------------------------------------------------
# Pure-JAX reference replicating the torch semantics (for validation)
# ----------------------------------------------------------------------------
def wiener_loss_ref(recon, target, lmbda=1e-4, reduction="mean"):
    B, C = recon.shape[:2]
    fshape = _get_filter_shape(recon.shape)
    Hf, Wf = fshape[1], fshape[2]
    rp = _pad_signal(recon.astype(jnp.float32), (Hf, Wf))
    tp = _pad_signal(target.astype(jnp.float32), (Hf, Wf))
    x, y = tp, rp                                     # mode='reverse'
    Fx = jnp.fft.fftn(x, axes=(2, 3))
    Fy = jnp.fft.fftn(y, axes=(2, 3))
    Fcc = Fx * jnp.conj(Fy)
    Fac = Fx * jnp.conj(Fx)
    r = jnp.sqrt(jnp.mean(jnp.abs(Fcc) ** 2))
    L = lmbda * r
    Fd = (Fcc / r + L) / (Fac / r + L)
    v = jnp.fft.ifftn(Fd, axes=(2, 3)).real           # == irfftn (Hermitian)
    v = jnp.roll(v, (-Hf // 2, -Wf // 2), axis=(2, 3))
    delta = jnp.zeros((Hf, Wf), jnp.float32).at[Hf // 2, Wf // 2].set(1.0)
    W = jnp.ones((Hf, Wf), jnp.float32)
    f = 0.5 * jnp.sqrt(jnp.sum((W * (v - delta)) ** 2, axis=(2, 3)))
    return f.mean() if reduction == "mean" else f.sum()


# ----------------------------------------------------------------------------
if __name__ == "__main__":
    key = jax.random.PRNGKey(0)
    k1, k2 = jax.random.split(key)
    recon = jax.random.normal(k1, (2, 4, 16, 16), dtype=jnp.float32)
    target = jax.random.normal(k2, (2, 4, 16, 16), dtype=jnp.float32)

    loss = jax.block_until_ready(wiener_loss(recon, target))
    ref = jax.block_until_ready(wiener_loss_ref(recon, target))

    assert bool(jnp.isfinite(loss)), "kernel produced non-finite loss"
    rel = abs(float(loss) - float(ref)) / max(abs(float(ref)), 1e-8)
    assert rel < 1e-3, f"mismatch: pallas={float(loss)} ref={float(ref)} rel={rel}"

    print("KERNEL_OK")
</pallas_src>

<mosaic_0001>
module attributes {stable_mosaic.version = 11 : i64} {
  func.func @kernel(%arg0: i32, %arg1: memref<128x62xf32, #tpu.memory_space<vmem>>, %arg2: memref<64x31xf32, #tpu.memory_space<vmem>>, %arg3: memref<62x124xf32, #tpu.memory_space<vmem>>, %arg4: memref<8x128xf32, #tpu.memory_space<vmem>>) attributes {dimension_semantics = [#tpu.dimension_semantics<parallel>], iteration_bounds = array<i64: 2>, scalar_prefetch = 0 : i64, scratch_operands = 0 : i64, tpu.core_type = #tpu.core_type<tc>, window_params = [{transform_indices = @transform_0, window_bounds = array<i64: 128, 62>}, {pipeline_mode = #tpu.pipeline_mode<synchronous>, transform_indices = @transform_1, window_bounds = array<i64: 64, 31>}, {pipeline_mode = #tpu.pipeline_mode<synchronous>, transform_indices = @transform_2, window_bounds = array<i64: 62, 124>}, {transform_indices = @transform_3, window_bounds = array<i64: 8, 128>}]} {
    %c0 = arith.constant 0 : index
    %c0_0 = arith.constant 0 : index
    %0 = vector.load %arg1[%c0, %c0_0] : memref<128x62xf32, #tpu.memory_space<vmem>>, vector<128x62xf32>
    %c0_1 = arith.constant 0 : index
    %c0_2 = arith.constant 0 : index
    %1 = vector.load %arg3[%c0_1, %c0_2] : memref<62x124xf32, #tpu.memory_space<vmem>>, vector<62x124xf32>
    %cst = arith.constant dense<0.000000e+00> : vector<128x124xf32>
    %2 = tpu.matmul %0, %1, %cst {dimension_numbers = #tpu.dot_dimension_numbers<[1], [0], [0], [1], [0, 0, 1, 1], [], []>} : vector<128x62xf32>, vector<62x124xf32>, vector<128x124xf32> -> vector<128x124xf32>
    %c0_3 = arith.constant 0 : index
    %c0_4 = arith.constant 0 : index
    %3 = vector.load %arg2[%c0_3, %c0_4] : memref<64x31xf32, #tpu.memory_space<vmem>>, vector<64x31xf32>
    %4 = vector.extract_strided_slice %2 {offsets = [0, 0], sizes = [31, 124], strides = [1, 1]} : vector<128x124xf32> to vector<31x124xf32>
    %cst_5 = arith.constant dense<0.000000e+00> : vector<64x124xf32>
    %5 = tpu.matmul %3, %4, %cst_5 {dimension_numbers = #tpu.dot_dimension_numbers<[1], [0], [0], [1], [0, 0, 1, 1], [], []>} : vector<64x31xf32>, vector<31x124xf32>, vector<64x124xf32> -> vector<64x124xf32>
    %6 = vector.extract_strided_slice %5 {offsets = [0, 0], sizes = [31, 124], strides = [1, 1]} : vector<64x124xf32> to vector<31x124xf32>
    %7 = vector.extract_strided_slice %5 {offsets = [32, 0], sizes = [31, 124], strides = [1, 1]} : vector<64x124xf32> to vector<31x124xf32>
    %8 = vector.extract_strided_slice %6 {offsets = [0, 0], sizes = [31, 31], strides = [1, 1]} : vector<31x124xf32> to vector<31x31xf32>
    %9 = vector.extract_strided_slice %7 {offsets = [0, 31], sizes = [31, 31], strides = [1, 1]} : vector<31x124xf32> to vector<31x31xf32>
    %10 = arith.subf %8, %9 : vector<31x31xf32>
    %11 = vector.extract_strided_slice %6 {offsets = [0, 31], sizes = [31, 31], strides = [1, 1]} : vector<31x124xf32> to vector<31x31xf32>
    %12 = vector.extract_strided_slice %7 {offsets = [0, 0], sizes = [31, 31], strides = [1, 1]} : vector<31x124xf32> to vector<31x31xf32>
    %13 = arith.addf %11, %12 : vector<31x31xf32>
    %14 = vector.extract_strided_slice %6 {offsets = [0, 62], sizes = [31, 31], strides = [1, 1]} : vector<31x124xf32> to vector<31x31xf32>
    %15 = vector.extract_strided_slice %7 {offsets = [0, 93], sizes = [31, 31], strides = [1, 1]} : vector<31x124xf32> to vector<31x31xf32>
    %16 = arith.subf %14, %15 : vector<31x31xf32>
    %17 = vector.extract_strided_slice %6 {offsets = [0, 93], sizes = [31, 31], strides = [1, 1]} : vector<31x124xf32> to vector<31x31xf32>
    %18 = vector.extract_strided_slice %7 {offsets = [0, 62], sizes = [31, 31], strides = [1, 1]} : vector<31x124xf32> to vector<31x31xf32>
    %19 = arith.addf %17, %18 : vector<31x31xf32>
    %20 = arith.mulf %10, %16 : vector<31x31xf32>
    %21 = arith.mulf %13, %19 : vector<31x31xf32>
    %22 = arith.addf %20, %21 : vector<31x31xf32>
    %23 = arith.mulf %13, %16 : vector<31x31xf32>
    %24 = arith.mulf %10, %19 : vector<31x31xf32>
    %25 = arith.subf %23, %24 : vector<31x31xf32>
    %26 = arith.mulf %22, %22 : vector<31x31xf32>
    %27 = arith.mulf %25, %25 : vector<31x31xf32>
    %28 = arith.addf %26, %27 : vector<31x31xf32>
    %29 = vector.shape_cast %28 : vector<31x31xf32> to vector<1x31x31xf32>
    %cst_6 = arith.constant dense<0.000000e+00> : vector<1xf32>
    %30 = vector.multi_reduction <add>, %29, %cst_6 [1, 2] : vector<1x31x31xf32> to vector<1xf32>
    %31 = vector.shape_cast %30 : vector<1xf32> to vector<1x1x1xf32>
    %32 = vector.extract %31[0, 0, 0] : f32 from vector<1x1x1xf32>
    %cst_7 = arith.constant 0.000000e+00 : f32
    %33 = arith.addf %cst_7, %32 : f32
    %34 = vector.extract_strided_slice %2 {offsets = [32, 0], sizes = [31, 124], strides = [1, 1]} : vector<128x124xf32> to vector<31x124xf32>
    %cst_8 = arith.constant dense<0.000000e+00> : vector<64x124xf32>
    %35 = tpu.matmul %3, %34, %cst_8 {dimension_numbers = #tpu.dot_dimension_numbers<[1], [0], [0], [1], [0, 0, 1, 1], [], []>} : vector<64x31xf32>, vector<31x124xf32>, vector<64x124xf32> -> vector<64x124xf32>
    %36 = vector.extract_strided_slice %35 {offsets = [0, 0], sizes = [31, 124], strides = [1, 1]} : vector<64x124xf32> to vector<31x124xf32>
    %37 = vector.extract_strided_slice %35 {offsets = [32, 0], sizes = [31, 124], strides = [1, 1]} : vector<64x124xf32> to vector<31x124xf32>
    %38 = vector.extract_strided_slice %36 {offsets = [0, 0], sizes = [31, 31], strides = [1, 1]} : vector<31x124xf32> to vector<31x31xf32>
    %39 = vector.extract_strided_slice %37 {offsets = [0, 31], sizes = [31, 31], strides = [1, 1]} : vector<31x124xf32> to vector<31x31xf32>
    %40 = arith.subf %38, %39 : vector<31x31xf32>
    %41 = vector.extract_strided_slice %36 {offsets = [0, 31], sizes = [31, 31], strides = [1, 1]} : vector<31x124xf32> to vector<31x31xf32>
    %42 = vector.extract_strided_slice %37 {offsets = [0, 0], sizes = [31, 31], strides = [1, 1]} : vector<31x124xf32> to vector<31x31xf32>
    %43 = arith.addf %41, %42 : vector<31x31xf32>
    %44 = vector.extract_strided_slice %36 {offsets = [0, 62], sizes = [31, 31], strides = [1, 1]} : vector<31x124xf32> to vector<31x31xf32>
    %45 = vector.extract_strided_slice %37 {offsets = [0, 93], sizes = [31, 31], strides = [1, 1]} : vector<31x124xf32> to vector<31x31xf32>
    %46 = arith.subf %44, %45 : vector<31x31xf32>
    %47 = vector.extract_strided_slice %36 {offsets = [0, 93], sizes = [31, 31], strides = [1, 1]} : vector<31x124xf32> to vector<31x31xf32>
    %48 = vector.extract_strided_slice %37 {offsets = [0, 62], sizes = [31, 31], strides = [1, 1]} : vector<31x124xf32> to vector<31x31xf32>
    %49 = arith.addf %47, %48 : vector<31x31xf32>
    %50 = arith.mulf %40, %46 : vector<31x31xf32>
    %51 = arith.mulf %43, %49 : vector<31x31xf32>
    %52 = arith.addf %50, %51 : vector<31x31xf32>
    %53 = arith.mulf %43, %46 : vector<31x31xf32>
    %54 = arith.mulf %40, %49 : vector<31x31xf32>
    %55 = arith.subf %53, %54 : vector<31x31xf32>
    %56 = arith.mulf %52, %52 : vector<31x31xf32>
    %57 = arith.mulf %55, %55 : vector<31x31xf32>
    %58 = arith.addf %56, %57 : vector<31x31xf32>
    %59 = vector.shape_cast %58 : vector<31x31xf32> to vector<1x31x31xf32>
    %cst_9 = arith.constant dense<0.000000e+00> : vector<1xf32>
    %60 = vector.multi_reduction <add>, %59, %cst_9 [1, 2] : vector<1x31x31xf32> to vector<1xf32>
    %61 = vector.shape_cast %60 : vector<1xf32> to vector<1x1x1xf32>
    %62 = vector.extract %61[0, 0, 0] : f32 from vector<1x1x1xf32>
    %63 = arith.addf %33, %62 : f32
    %64 = vector.extract_strided_slice %2 {offsets = [64, 0], sizes = [31, 124], strides = [1, 1]} : vector<128x124xf32> to vector<31x124xf32>
    %cst_10 = arith.constant dense<0.000000e+00> : vector<64x124xf32>
    %65 = tpu.matmul %3, %64, %cst_10 {dimension_numbers = #tpu.dot_dimension_numbers<[1], [0], [0], [1], [0, 0, 1, 1], [], []>} : vector<64x31xf32>, vector<31x124xf32>, vector<64x124xf32> -> vector<64x124xf32>
    %66 = vector.extract_strided_slice %65 {offsets = [0, 0], sizes = [31, 124], strides = [1, 1]} : vector<64x124xf32> to vector<31x124xf32>
    %67 = vector.extract_strided_slice %65 {offsets = [32, 0], sizes = [31, 124], strides = [1, 1]} : vector<64x124xf32> to vector<31x124xf32>
    %68 = vector.extract_strided_slice %66 {offsets = [0, 0], sizes = [31, 31], strides = [1, 1]} : vector<31x124xf32> to vector<31x31xf32>
    %69 = vector.extract_strided_slice %67 {offsets = [0, 31], sizes = [31, 31], strides = [1, 1]} : vector<31x124xf32> to vector<31x31xf32>
    %70 = arith.subf %68, %69 : vector<31x31xf32>
    %71 = vector.extract_strided_slice %66 {offsets = [0, 31], sizes = [31, 31], strides = [1, 1]} : vector<31x124xf32> to vector<31x31xf32>
    %72 = vector.extract_strided_slice %67 {offsets = [0, 0], sizes = [31, 31], strides = [1, 1]} : vector<31x124xf32> to vector<31x31xf32>
    %73 = arith.addf %71, %72 : vector<31x31xf32>
    %74 = vector.extract_strided_slice %66 {offsets = [0, 62], sizes = [31, 31], strides = [1, 1]} : vector<31x124xf32> to vector<31x31xf32>
    %75 = vector.extract_strided_slice %67 {offsets = [0, 93], sizes = [31, 31], strides = [1, 1]} : vector<31x124xf32> to vector<31x31xf32>
    %76 = arith.subf %74, %75 : vector<31x31xf32>
    %77 = vector.extract_strided_slice %66 {offsets = [0, 93], sizes = [31, 31], strides = [1, 1]} : vector<31x124xf32> to vector<31x31xf32>
    %78 = vector.extract_strided_slice %67 {offsets = [0, 62], sizes = [31, 31], strides = [1, 1]} : vector<31x124xf32> to vector<31x31xf32>
    %79 = arith.addf %77, %78 : vector<31x31xf32>
    %80 = arith.mulf %70, %76 : vector<31x31xf32>
    %81 = arith.mulf %73, %79 : vector<31x31xf32>
    %82 = arith.addf %80, %81 : vector<31x31xf32>
    %83 = arith.mulf %73, %76 : vector<31x31xf32>
    %84 = arith.mulf %70, %79 : vector<31x31xf32>
    %85 = arith.subf %83, %84 : vector<31x31xf32>
    %86 = arith.mulf %82, %82 : vector<31x31xf32>
    %87 = arith.mulf %85, %85 : vector<31x31xf32>
    %88 = arith.addf %86, %87 : vector<31x31xf32>
    %89 = vector.shape_cast %88 : vector<31x31xf32> to vector<1x31x31xf32>
    %cst_11 = arith.constant dense<0.000000e+00> : vector<1xf32>
    %90 = vector.multi_reduction <add>, %89, %cst_11 [1, 2] : vector<1x31x31xf32> to vector<1xf32>
    %91 = vector.shape_cast %90 : vector<1xf32> to vector<1x1x1xf32>
    %92 = vector.extract %91[0, 0, 0] : f32 from vector<1x1x1xf32>
    %93 = arith.addf %63, %92 : f32
    %94 = vector.extract_strided_slice %2 {offsets = [96, 0], sizes = [31, 124], strides = [1, 1]} : vector<128x124xf32> to vector<31x124xf32>
    %cst_12 = arith.constant dense<0.000000e+00> : vector<64x124xf32>
    %95 = tpu.matmul %3, %94, %cst_12 {dimension_numbers = #tpu.dot_dimension_numbers<[1], [0], [0], [1], [0, 0, 1, 1], [], []>} : vector<64x31xf32>, vector<31x124xf32>, vector<64x124xf32> -> vector<64x124xf32>
    %96 = vector.extract_strided_slice %95 {offsets = [0, 0], sizes = [31, 124], strides = [1, 1]} : vector<64x124xf32> to vector<31x124xf32>
    %97 = vector.extract_strided_slice %95 {offsets = [32, 0], sizes = [31, 124], strides = [1, 1]} : vector<64x124xf32> to vector<31x124xf32>
    %98 = vector.extract_strided_slice %96 {offsets = [0, 0], sizes = [31, 31], strides = [1, 1]} : vector<31x124xf32> to vector<31x31xf32>
    %99 = vector.extract_strided_slice %97 {offsets = [0, 31], sizes = [31, 31], strides = [1, 1]} : vector<31x124xf32> to vector<31x31xf32>
    %100 = arith.subf %98, %99 : vector<31x31xf32>
    %101 = vector.extract_strided_slice %96 {offsets = [0, 31], sizes = [31, 31], strides = [1, 1]} : vector<31x124xf32> to vector<31x31xf32>
    %102 = vector.extract_strided_slice %97 {offsets = [0, 0], sizes = [31, 31], strides = [1, 1]} : vector<31x124xf32> to vector<31x31xf32>
    %103 = arith.addf %101, %102 : vector<31x31xf32>
    %104 = vector.extract_strided_slice %96 {offsets = [0, 62], sizes = [31, 31], strides = [1, 1]} : vector<31x124xf32> to vector<31x31xf32>
    %105 = vector.extract_strided_slice %97 {offsets = [0, 93], sizes = [31, 31], strides = [1, 1]} : vector<31x124xf32> to vector<31x31xf32>
    %106 = arith.subf %104, %105 : vector<31x31xf32>
    %107 = vector.extract_strided_slice %96 {offsets = [0, 93], sizes = [31, 31], strides = [1, 1]} : vector<31x124xf32> to vector<31x31xf32>
    %108 = vector.extract_strided_slice %97 {offsets = [0, 62], sizes = [31, 31], strides = [1, 1]} : vector<31x124xf32> to vector<31x31xf32>
    %109 = arith.addf %107, %108 : vector<31x31xf32>
    %110 = arith.mulf %100, %106 : vector<31x31xf32>
    %111 = arith.mulf %103, %109 : vector<31x31xf32>
    %112 = arith.addf %110, %111 : vector<31x31xf32>
    %113 = arith.mulf %103, %106 : vector<31x31xf32>
    %114 = arith.mulf %100, %109 : vector<31x31xf32>
    %115 = arith.subf %113, %114 : vector<31x31xf32>
    %116 = arith.mulf %112, %112 : vector<31x31xf32>
    %117 = arith.mulf %115, %115 : vector<31x31xf32>
    %118 = arith.addf %116, %117 : vector<31x31xf32>
    %119 = vector.shape_cast %118 : vector<31x31xf32> to vector<1x31x31xf32>
    %cst_13 = arith.constant dense<0.000000e+00> : vector<1xf32>
    %120 = vector.multi_reduction <add>, %119, %cst_13 [1, 2] : vector<1x31x31xf32> to vector<1xf32>
    %121 = vector.shape_cast %120 : vector<1xf32> to vector<1x1x1xf32>
    %122 = vector.extract %121[0, 0, 0] : f32 from vector<1x1x1xf32>
    %123 = arith.addf %93, %122 : f32
    %124 = tpu.iota {dimensions = array<i32: 0>} : vector<8x128xi32>
    %125 = tpu.iota {dimensions = array<i32: 1>} : vector<8x128xi32>
    %c0_i32 = arith.constant 0 : i32
    %126 = vector.broadcast %c0_i32 : i32 to vector<8x128xi32>
    %127 = arith.cmpi eq, %124, %126 : vector<8x128xi32>
    %c0_i32_14 = arith.constant 0 : i32
    %128 = vector.broadcast %c0_i32_14 : i32 to vector<8x128xi32>
    %129 = arith.cmpi eq, %125, %128 : vector<8x128xi32>
    %130 = arith.andi %127, %129 : vector<8x128xi1>
    %cst_15 = arith.constant 0.000000e+00 : f32
    %131 = vector.broadcast %123 : f32 to vector<8x128xf32>
    %132 = vector.broadcast %cst_15 : f32 to vector<8x128xf32>
    %133 = arith.select %130, %131, %132 : vector<8x128xi1>, vector<8x128xf32>
    %c0_16 = arith.constant 0 : index
    %c0_17 = arith.constant 0 : index
    %134 = vector.load %arg4[%c0_16, %c0_17] : memref<8x128xf32, #tpu.memory_space<vmem>>, vector<8x128xf32>
    tpu.vector_store %arg4[%c0_16, %c0_17], %133 {strides = array<i32>} : memref<8x128xf32, #tpu.memory_space<vmem>>, vector<8x128xf32>,
    return
  }
  func.func @transform_0(%arg0: i32) -> (i32, i32) {
    %c0_i32 = arith.constant 0 : i32
    %c0_i32_0 = arith.constant 0 : i32
    return %arg0, %c0_i32 : i32, i32
  }
  func.func @transform_1(%arg0: i32) -> (i32, i32) {
    %c0_i32 = arith.constant 0 : i32
    %c0_i32_0 = arith.constant 0 : i32
    %c0_i32_1 = arith.constant 0 : i32
    return %c0_i32, %c0_i32_0 : i32, i32
  }
  func.func @transform_2(%arg0: i32) -> (i32, i32) {
    %c0_i32 = arith.constant 0 : i32
    %c0_i32_0 = arith.constant 0 : i32
    %c0_i32_1 = arith.constant 0 : i32
    return %c0_i32, %c0_i32_0 : i32, i32
  }
  func.func @transform_3(%arg0: i32) -> (i32, i32) {
    %c0_i32 = arith.constant 0 : i32
    %c0_i32_0 = arith.constant 0 : i32
    return %arg0, %c0_i32 : i32, i32
  }
}

</mosaic_0001>

<bundles_post_ra>
// kernel: tpu_custom_call.1
= control target key start
LH: loop header
LB: loop body
LE: loop exit
PB: predicated region body
PF: predicated region fallthrough
CT: control target
= control target key end

     0   :  { %8 = vsyncpa [#allocation3], 0  ;;  %s2386_s0 = inlined_call_operand.vmem [shape: f32[256,62], index: 0, kind: input, shape index: {}]   ;;  %s2387_s1 = inlined_call_operand.vmem [shape: f32[64,31], index: 1, kind: input, shape index: {}]   ;;  %s2388_s2 = inlined_call_operand.vmem [shape: f32[62,124], index: 2, kind: input, shape index: {}]   ;;  %s2389_s3 = inlined_call_operand.hbm [shape: f32[16,128], index: 3, kind: output, shape index: {}]  }
   0x1   :  { %10 = vsyncpa [#allocation3 + $0x1], 0  ;;  %s1596_s12 = smov 0   ;;  %s1598_s13 = smov 0  }
   0x2   :  { %s1600_s14 = smov 0   ;;  %s1602_s15 = smov 0  }
   0x3 LB: > { %s1617_s16 = sadd.s32 4294967295, %s1570_s15   ;;  %s1381_s17 = sadd.s32 4294967294, %s1570_s15   ;;  %s1570_s15 = sphi %s1602_s15, %s2414_s15   ;;  %s1566_s14 = sphi %s1600_s14, %s2413_s14   ;;  %s1562_s13 = sphi %s1598_s13, %s2412_s13   ;;  %s1558_s12 = sphi %s1596_s12, %s2411_s12  }
   0x4   : > { %s1621_s18 = sadd.s32 1, %s1570_s15   ;;  %s91_s19 = sadd.s32 1, %s1566_s14 }
   0x5   : > { %s88_s20 = ssub.s32 %s1570_s15, %s1621_s18  ;;  %p101_p0 = scmp.ne.s32.totalorder %s1566_s14, %s1562_s13 }
   0x6   : > { %p89_p1 = scmp.eq.s32.totalorder %s88_s20, 0  ;;  %p102_p2 = scmp.eq.s32.totalorder %s1617_s16, 1 }
   0x7   : > { %p107_p3 = scmp.ne.s32.totalorder %s1562_s13, %s1558_s12  ;;  %p108_p4 = scmp.eq.s32.totalorder %s1381_s17, 1 }
   0x8   : > { %s1632_s21 = scalar_select %p89_p1, %s1566_s14, %s91_s19  }
   0x9   : > { %p1634_p5 = por %p102_p2, %p101_p0  ;;  %p1638_p6 = por %p108_p4, %p107_p3 }
   0xa   : > { %p1384_p7 = scmp.ge.s32.totalorder %s1570_s15, 1  ;;  %p141_p8 = scmp.lt.s32.totalorder %s1570_s15, 3 }
   0xc   : > { %p142_p9 = pnand %p1384_p7, %p141_p8 }
   0xe   : > { %145 = sbr.rel (%p142_p9) target bundleno = 1168 (0x490), region = 32 }
  0x13   : > { %v194_v0 = vld [vmem:[%s2388_s2 + $0x38] sm:$0x3f]  ;;  %vm244_vm0 = vcmask 1045504   ;;  %v193_v1 = vld [vmem:[%s2388_s2 + $0x30] sm:$0xff]  ;;  %s1386_s28 = sshll.u32 %s1617_s16, 4  ;;  %v192_v2 = vld [vmem:[%s2388_s2 + $0x28] sm:$0xff] }
  0x14   : > { %1388 = vmatpush.msk.msra.mxu0 %vm244_vm0, %v194_v0  ;;  %1445 = vmatpush.msk.msra.mxu2 %vm244_vm0, %v194_v0  ;;  %p166_p10 = scmp.lt.s32.totalorder %s1386_s28, 31  ;;  %v191_v3 = vld [vmem:[%s2388_s2 + $0x20] sm:$0xff]  ;;  %v190_v4 = vld [vmem:[%s2388_s2 + $0x18] sm:$0xff]  ;;  %v189_v5 = vld [vmem:[%s2388_s2 + $0x10] sm:$0xff]  ;;  %vm195_vm1 = vcmask 506880   ;;  %vm346_vm2 = vcmask 1046528  }
  0x15   : > { %v188_v6 = vld [vmem:[%s2388_s2 + $0x8] sm:$0xff]  ;;  %v187_v7 = vld [vmem:[%s2388_s2] sm:$0xff]  ;;  %vm321_vm3 = vcmask 252928   ;;  %v319_v36 = vld [vmem:[%s2387_s1 + $0x30] sm:$0xff]  ;;  %s1572_s25 = smov 31   ;;  %s1573_s26 = smov 97  }
  0x16   : > { %257 = vmatpush.msra.mxu0 %v193_v1  ;;  %s2416_s28 = smov (!%p166_p10, %s1386_s28), 31  ;;  %1446 = vmatpush.msra.mxu2 %v193_v1  ;;  %v313_v31 = vld [vmem:[%s2387_s1] sm:$0xff]  ;;  %v318_v32 = vld [vmem:[%s2387_s1 + $0x28] sm:$0xff]  ;;  %v315_v38 = vld [vmem:[%s2387_s1 + $0x10] sm:$0xff]  ;;  %s1574_s27 = smov 66   ;;  %vm572_vm4 = vcmask 251904  }
  0x17   : > { %s1387_s8 = sshll.u32 %s2416_s28, 3  ;;  %v314_v35 = vld [vmem:[%s2387_s1 + $0x8] sm:$0xff]  ;;  %v320_v39 = vld [vmem:[%s2387_s1 + $0x38] sm:$0xff]  ;;  %v317_v43 = vld [vmem:[%s2387_s1 + $0x20] sm:$0xff]  ;;  %s1575_s28 = smov 35  }
  0x18   : > { %258 = vmatpush.msra.mxu0 %v192_v2  ;;  %1447 = vmatpush.msra.mxu2 %v192_v2  ;;  %s1669_s24 = scalar_lea.vmem %s2386_s0, %s1387_s8  ;;  %v316_v41 = vld [vmem:[%s2387_s1 + $0x18] sm:$0xff]  ;;  %s162_s29 = sand.u32 1, %s1562_s13  }
  0x19   : > { %v171_v8 = vld [vmem:[%s1669_s24] sm:$0xff]  ;;  %v172_v10 = vld [vmem:[%s1669_s24 + $0x8] sm:$0xff]  ;;  %v173_v12 = vld [vmem:[%s1669_s24 + $0x10] sm:$0xff]  ;;  %s1385_s4 = sshll.u32 %s162_s29, 3  ;;  %s1442_s6 = sshll.u32 %s1617_s16, 3 }
  0x1a   : > { %259 = vmatpush.msra.mxu0 %v191_v3  ;;  %1448 = vmatpush.msra.mxu2 %v191_v3  ;;  %v183_v9 = vld [vmem:[%s1669_s24 + $0x60] sm:$0xff]  ;;  %v184_v11 = vld [vmem:[%s1669_s24 + $0x68] sm:$0xff]  ;;  %v185_v13 = vld [vmem:[%s1669_s24 + $0x70] sm:$0xff]  ;;  %s1317_s10 = scalar_lea.hbm %s2389_s3, %s1442_s6  ;;  %s164_s19 = scalar_lea.vmem [#allocation2], %s1385_s4 }
  0x1b   : > { %v174_v14 = vld [vmem:[%s1669_s24 + $0x18] sm:$0xff]  ;;  %v175_v16 = vld [vmem:[%s1669_s24 + $0x20] sm:$0xff]  ;;  %v176_v17 = vld [vmem:[%s1669_s24 + $0x28] sm:$0xff]  ;;  %s1319_s20 = sshll.u32 %s164_s19, 4  ;;  %s1307_s16 = scalar_lea.sflag [#allocation3], %s162_s29  ;;  %s1320_s20 = int_to_ptr.vmem [resolvable:$true] %s1319_s20 }
  0x1c   : > { %260 = vmatpush.msra.mxu0 %v190_v4  ;;  %1449 = vmatpush.msra.mxu2 %v190_v4  ;;  %v186_v15 = vld [vmem:[%s1669_s24 + $0x78] sm:$0xff]  ;;  %v177_v18 = vld [vmem:[%s1669_s24 + $0x30] sm:$0xff]  ;;  %v179_v20 = vld [vmem:[%s1669_s24 + $0x40] sm:$0xff] }
  0x1d   : > { %v178_v19 = vld [vmem:[%s1669_s24 + $0x38] sm:$0xff]  ;;  %v180_v21 = vld [vmem:[%s1669_s24 + $0x48] sm:$0xff]  ;;  %v181_v22 = vld [vmem:[%s1669_s24 + $0x50] sm:$0xff] }
  0x1e   : > { %261 = vmatpush.msra.mxu0 %v189_v5  ;;  %1450 = vmatpush.msra.mxu2 %v189_v5  ;;  %v182_v23 = vld [vmem:[%s1669_s24 + $0x58] sm:$0xff] }
  0x20   : > { %262 = vmatpush.msra.mxu0 %v188_v6  ;;  %1451 = vmatpush.msra.mxu2 %v188_v6 }
  0x22   : > { %263 = vmatpush.msra.mxu0 %v187_v7  ;;  %1452 = vmatpush.msra.mxu2 %v187_v7 }
  0x23   : > { %1389 = vmatmul.msk.f32.vlgmr.msra.gmra.mxu0 %vm195_vm1, %v171_v8  ;;  %1401 = vmatmul.msk.f32.vlgmr.msra.gmra.mxu2 %vm195_vm1, %v183_v9 }
  0x2b   : > { %1390 = vmatmul.msk.f32.gmra.mxu0 %vm195_vm1, %v172_v10  ;;  %1402 = vmatmul.msk.f32.gmra.mxu2 %vm195_vm1, %v184_v11 }
  0x33   : > { %1391 = vmatmul.msk.f32.gmra.mxu0 %vm195_vm1, %v173_v12  ;;  %1403 = vmatmul.msk.f32.gmra.mxu2 %vm195_vm1, %v185_v13 }
  0x3b   : > { %1392 = vmatmul.msk.f32.gmra.mxu0 %vm195_vm1, %v174_v14  ;;  %1404 = vmatmul.msk.f32.gmra.mxu2 %vm195_vm1, %v186_v15 }
  0x43   : > { %1393 = vmatmul.msk.f32.gmra.mxu0 %vm195_vm1, %v175_v16 }
  0x4b   : > { %1394 = vmatmul.msk.f32.gmra.mxu0 %vm195_vm1, %v176_v17 }
  0x53   : > { %1395 = vmatmul.msk.f32.gmra.mxu0 %vm195_vm1, %v177_v18 }
  0x5b   : > { %1396 = vmatmul.msk.f32.gmra.mxu0 %vm195_vm1, %v178_v19 }
  0x63   : > { %1397 = vmatmul.msk.f32.gmra.mxu0 %vm195_vm1, %v179_v20 }
  0x6b   : > { %1398 = vmatmul.msk.f32.gmra.mxu0 %vm195_vm1, %v180_v21 }
  0x73   : > { %1399 = vmatmul.msk.f32.gmra.mxu0 %vm195_vm1, %v181_v22 }
  0x7b   : > { %1400 = vmatmul.msk.f32.gmra.mxu0 %vm195_vm1, %v182_v23 }
  0xa0   : > { %v265_v24 = vpop.f32.mrf.mxu0 }
  0xa6   : > { %v301_v25 = vpop.f32.mrf.mxu2 }
  0xa8   : > { %v268_v26 = vpop.f32.mrf.mxu0 }
  0xae   : > { %v304_v27 = vpop.f32.mrf.mxu2 }
  0xb0   : > { %v271_v28 = vpop.f32.mrf.mxu0 }
  0xb6   : > { %v307_v29 = vpop.f32.mrf.mxu2 }
  0xb8   : > { %v274_v30 = vpop.f32.mrf.mxu0 }
  0xb9   : > { %1405 = vmatpush.msk.msra.mxu1 %vm346_vm2, %v274_v30  ;;  %1453 = vmatpush.msk.msra.mxu3 %vm346_vm2, %v274_v30 }
  0xbb   : > { %363 = vmatpush.msra.mxu1 %v271_v28  ;;  %1454 = vmatpush.msra.mxu3 %v271_v28 }
  0xbd   : > { %364 = vmatpush.msra.mxu1 %v268_v26  ;;  %1455 = vmatpush.msra.mxu3 %v268_v26 }
  0xbe   : > { %v310_v33 = vpop.f32.mrf.mxu2 }
  0xbf   : > { %365 = vmatpush.msra.mxu1 %v265_v24  ;;  %1456 = vmatpush.msra.mxu3 %v265_v24 }
  0xc0   : > { %v277_v34 = vpop.f32.mrf.mxu0  ;;  %1406 = vmatmul.msk.f32.vlgmr.msra.gmra.mxu1 %vm321_vm3, %v313_v31  ;;  %1411 = vmatmul.msk.f32.vlgmr.msra.gmra.mxu3 %vm321_vm3, %v318_v32 }
  0xc1   : > { %1432 = vmatpush.msk.msrb.mxu1 %vm346_vm2, %v310_v33 }
  0xc3   : > { %1075 = vmatpush.msrb.mxu1 %v307_v29 }
  0xc5   : > { %1076 = vmatpush.msrb.mxu1 %v304_v27 }
  0xc7   : > { %1077 = vmatpush.msrb.mxu1 %v301_v25 }
  0xc8   : > { %v280_v37 = vpop.f32.mrf.mxu0  ;;  %1407 = vmatmul.msk.f32.gmra.mxu1 %vm321_vm3, %v314_v35  ;;  %1412 = vmatmul.msk.f32.gmra.mxu3 %vm321_vm3, %v319_v36 }
  0xd0   : > { %v283_v40 = vpop.f32.mrf.mxu0  ;;  %1408 = vmatmul.msk.f32.gmra.mxu1 %vm321_vm3, %v315_v38  ;;  %1413 = vmatmul.msk.f32.gmra.mxu3 %vm321_vm3, %v320_v39 }
  0xd8   : > { %v286_v42 = vpop.f32.mrf.mxu0  ;;  %1409 = vmatmul.msk.f32.gmra.mxu1 %vm321_vm3, %v316_v41 }
  0xd9   : > { %1414 = vmatpush.msk.msrb.mxu2 %vm346_vm2, %v286_v42 }
  0xdb   : > { %601 = vmatpush.msrb.mxu2 %v283_v40 }
  0xdd   : > { %602 = vmatpush.msrb.mxu2 %v280_v37 }
  0xdf   : > { %603 = vmatpush.msrb.mxu2 %v277_v34 }
  0xe0   : > { %v289_v44 = vpop.f32.mrf.mxu0  ;;  %1410 = vmatmul.msk.f32.gmra.mxu1 %vm321_vm3, %v317_v43  ;;  %1415 = vmatmul.msk.f32.vlgmr.msrb.gmra.mxu2 %vm321_vm3, %v313_v31 }
  0xe8   : > { %v292_v45 = vpop.f32.mrf.mxu0  ;;  %1416 = vmatmul.msk.f32.gmra.mxu2 %vm321_vm3, %v314_v35  ;;  %1433 = vmatmul.msk.f32.vlgmr.msrb.gmra.mxu1 %vm321_vm3, %v313_v31 }
  0xf0   : > { %v295_v46 = vpop.f32.mrf.mxu0  ;;  %1417 = vmatmul.msk.f32.gmra.mxu2 %vm321_vm3, %v315_v38  ;;  %1434 = vmatmul.msk.f32.gmra.mxu1 %vm321_vm3, %v314_v35 }
  0xf8   : > { %v298_v47 = vpop.f32.mrf.mxu0  ;;  %1418 = vmatmul.msk.f32.gmra.mxu2 %vm321_vm3, %v316_v41  ;;  %1435 = vmatmul.msk.f32.gmra.mxu1 %vm321_vm3, %v315_v38 }
  0xf9   : > { %1423 = vmatpush.msk.msrb.mxu3 %vm346_vm2, %v298_v47 }
  0xfb   : > { %838 = vmatpush.msrb.mxu3 %v295_v46 }
  0xfd   : > { %839 = vmatpush.msrb.mxu3 %v292_v45 }
  0xff   : > { %840 = vmatpush.msrb.mxu3 %v289_v44 }
 0x100   : > { %1419 = vmatmul.msk.f32.gmra.mxu2 %vm321_vm3, %v317_v43  ;;  %1424 = vmatmul.msk.f32.vlgmr.msrb.gmra.mxu3 %vm321_vm3, %v313_v31 }
 0x101   : > { %1436 = vmatmul.msk.f32.gmra.mxu1 %vm321_vm3, %v316_v41 }
 0x108   : > { %1420 = vmatmul.msk.f32.gmra.mxu2 %vm321_vm3, %v318_v32  ;;  %1425 = vmatmul.msk.f32.gmra.mxu3 %vm321_vm3, %v314_v35 }
 0x109   : > { %1437 = vmatmul.msk.f32.gmra.mxu1 %vm321_vm3, %v317_v43 }
 0x110   : > { %1421 = vmatmul.msk.f32.gmra.mxu2 %vm321_vm3, %v319_v36  ;;  %1426 = vmatmul.msk.f32.gmra.mxu3 %vm321_vm3, %v315_v38 }
 0x111   : > { %1438 = vmatmul.msk.f32.gmra.mxu1 %vm321_vm3, %v318_v32 }
 0x118   : > { %1427 = vmatmul.msk.f32.gmra.mxu3 %vm321_vm3, %v316_v41  ;;  %1422 = vmatmul.msk.f32.gmra.mxu2 %vm321_vm3, %v320_v39 }
 0x119   : > { %1439 = vmatmul.msk.f32.gmra.mxu1 %vm321_vm3, %v319_v36 }
 0x120   : > { %1428 = vmatmul.msk.f32.gmra.mxu3 %vm321_vm3, %v317_v43 }
 0x121   : > { %1440 = vmatmul.msk.f32.gmra.mxu1 %vm321_vm3, %v320_v39 }
 0x128   : > { %1429 = vmatmul.msk.f32.gmra.mxu3 %vm321_vm3, %v318_v32 }
 0x130   : > { %1430 = vmatmul.msk.f32.gmra.mxu3 %vm321_vm3, %v319_v36 }
 0x138   : > { %1431 = vmatmul.msk.f32.gmra.mxu3 %vm321_vm3, %v320_v39 }
 0x13d   : > { %v1767_v48 = vpop.f32.mrf.mxu1 }
 0x143   : > { %v382_v49 = vpop.f32.mrf.mxu3 }
 0x144   : > { %413 = vrot.lane.b32.xlu2 %v382_v49, %s1572_s25  ;;  %397 = vrot.lane.b32.xlu0 %v382_v49, %s1573_s26 }
 0x145   : > { %v370_v50 = vpop.f32.mrf.mxu1 }
 0x14b   : > { %v385_v51 = vpop.f32.mrf.mxu3 }
 0x14c   : > { %415 = vrot.lane.b32.xlu0 %v385_v51, %s1572_s25  ;;  %399 = vrot.lane.b32.xlu1 %v385_v51, %s1573_s26 }
 0x14d   : > { %v1773_v52 = vpop.f32.mrf.mxu1 }
 0x153   : > { %v388_v53 = vpop.f32.mrf.mxu3 }
 0x154   : > { %401 = vrot.lane.b32.xlu1 %v388_v53, %s1573_s26 }
 0x155   : > { %v1776_v54 = vpop.f32.mrf.mxu1 }
 0x15c   : > { %417 = vrot.lane.b32.xlu1 %v388_v53, %s1572_s25 }
 0x15d   : > { %v379_v55 = vpop.f32.mrf.mxu1 }
 0x15e   : > { %411 = vrot.lane.b32.xlu2 %v379_v55, %s1572_s25  ;;  %395 = vrot.lane.b32.xlu0 %v379_v55, %s1573_s26 }
 0x163   : > { %v1781_v56 = vpop.f32.mrf.mxu2 }
 0x165   : > { %v1783_v57 = vpop.f32.mrf.mxu1 }
 0x16b   : > { %v1785_v58 = vpop.f32.mrf.mxu2 }
 0x16d   : > { %v1787_v59 = vpop.f32.mrf.mxu1 }
 0x173   : > { %v1789_v60 = vpop.f32.mrf.mxu2 }
 0x175   : > { %v1791_v61 = vpop.f32.mrf.mxu1 }
 0x17b   : > { %v1793_v62 = vpop.f32.mrf.mxu2 }
 0x17e   : > { %v1795_v63 = vpop.f32.mrf.mxu1 }
 0x183   : > { %v617_v0 = vpop.f32.mrf.mxu2  ;;  %v1797_v1 = vpop.f32.mrf.mxu3 }
 0x184   : > { %633 = vrot.lane.b32.xlu1 %v617_v0, %s1573_s26 }
 0x186   : > { %v1091_v2 = vpop.f32.mrf.mxu1 }
 0x187   : > { %1123 = vrot.lane.b32.xlu2 %v1091_v2, %s1572_s25 }
 0x18b   : > { %v620_v3 = vpop.f32.mrf.mxu2  ;;  %v1801_v4 = vpop.f32.mrf.mxu3 }
 0x18c   : > { %649 = vrot.lane.b32.xlu1 %v617_v0, %s1572_s25 }
 0x18e   : > { %v1094_v5 = vpop.f32.mrf.mxu1 }
 0x18f   : > { %1107 = vrot.lane.b32.xlu2 %v1091_v2, %s1573_s26  ;;  %1125 = vrot.lane.b32.xlu0 %v1094_v5, %s1572_s25 }
 0x193   : > { %v623_v6 = vpop.f32.mrf.mxu2  ;;  %v1806_v7 = vpop.f32.mrf.mxu3 }
 0x194   : > { %637 = vrot.lane.b32.xlu1 %v623_v6, %s1573_s26 }
 0x196   : > { %v1097_v8 = vpop.f32.mrf.mxu1 }
 0x197   : > { %1109 = vrot.lane.b32.xlu0 %v1094_v5, %s1573_s26  ;;  %635 = vrot.lane.b32.xlu2 %v620_v3, %s1573_s26 }
 0x19b   : > { %v1811_v9 = vpop.f32.mrf.mxu3  ;;  %v626_v13 = vpop.f32.mrf.mxu2 }
 0x19c   : > { %653 = vrot.lane.b32.xlu1 %v623_v6, %s1572_s25 }
 0x19e   : > { %v1100_v10 = vpop.f32.mrf.mxu1  ;;  %v414_v15 = vpop.permute.xlu2 %413 }
 0x19f   : > { %1111 = vrot.lane.b32.xlu0 %v1097_v8, %s1573_s26  ;;  %651 = vrot.lane.b32.xlu2 %v620_v3, %s1572_s25  ;;  %v1825_v16 = vadd.f32 %v414_v15, %v370_v50 }
 0x1a3   : > { %v854_v11 = vpop.f32.mrf.mxu3 }
 0x1a4   : > { %1113 = vrot.lane.b32.xlu1 %v1100_v10, %s1573_s26 }
 0x1a7   : > { %1129 = vrot.lane.b32.xlu0 %v1100_v10, %s1572_s25  ;;  %1127 = vrot.lane.b32.xlu2 %v1097_v8, %s1572_s25 }
 0x1ab   : > { %v857_v12 = vpop.f32.mrf.mxu3 }
 0x1ac   : > { %872 = vrot.lane.b32.xlu1 %v857_v12, %s1573_s26 }
 0x1af   : > { %639 = vrot.lane.b32.xlu2 %v626_v13, %s1573_s26  ;;  %870 = vrot.lane.b32.xlu0 %v854_v11, %s1573_s26 }
 0x1b3   : > { %v860_v14 = vpop.f32.mrf.mxu3 }
 0x1b4   : > { %890 = vrot.lane.b32.xlu1 %v860_v14, %s1572_s25 }
 0x1b6   : > { %v398_v17 = vpop.permute.xlu0 %397 }
 0x1b7   : > { %655 = vrot.lane.b32.xlu2 %v626_v13, %s1572_s25  ;;  %888 = vrot.lane.b32.xlu0 %v857_v12, %s1572_s25  ;;  %v1829_v18 = vsub.f32 %v370_v50, %v398_v17 }
 0x1b8   : > { %v412_v26 = vpop.permute.xlu2 %411 }
 0x1b9   : > { %v1864_v29 = vadd.f32 %v412_v26, %v1767_v48 }
 0x1bb   : > { %v863_v21 = vpop.f32.mrf.mxu3 }
 0x1bc   : > { %453 = vrot.lane.b32.xlu1 %v1825_v16, %s1574_s27 }
 0x1be   : > { %v400_v19 = vpop.permute.xlu1 %399  ;;  %v416_v22 = vpop.permute.xlu0 %415 }
 0x1bf   : > { %886 = vrot.lane.b32.xlu2 %v854_v11, %s1572_s25  ;;  %433 = vrot.lane.b32.xlu0 %v1829_v18, %s1574_s27  ;;  %v1841_v23 = vadd.f32 %v416_v22, %v1773_v52  ;;  %v1856_v27 = vsub.f32 %v1773_v52, %v400_v19 }
 0x1c4   : > { %505 = vrot.lane.b32.xlu1 %v1825_v16, %s1575_s28 }
 0x1c6   : > { %v402_v20 = vpop.permute.xlu1 %401 }
 0x1c7   : > { %489 = vrot.lane.b32.xlu0 %v1829_v18, %s1573_s26  ;;  %874 = vrot.lane.b32.xlu2 %v860_v14, %s1573_s26  ;;  %v1861_v28 = vsub.f32 %v1776_v54, %v402_v20 }
 0x1cc   : > { %892 = vrot.lane.b32.xlu1 %v863_v21, %s1572_s25 }
 0x1ce   : > { %v418_v24 = vpop.permute.xlu1 %417 }
 0x1cf   : > { %v1844_v25 = vadd.f32 %v418_v24, %v1776_v54  ;;  %455 = vrot.lane.b32.xlu2 %v1841_v23, %s1574_s27 }
 0x1d0   : > { %v396_v32 = vpop.permute.xlu0 %395 }
 0x1d1   : > { %457 = vrot.lane.b32.xlu0 %v1844_v25, %s1574_s27  ;;  %v1877_v33 = vsub.f32 %v1767_v48, %v396_v32 }
 0x1d4   : > { %876 = vrot.lane.b32.xlu1 %v863_v21, %s1573_s26 }
 0x1d7   : > { %507 = vrot.lane.b32.xlu2 %v1841_v23, %s1575_s28 }
 0x1d9   : > { %509 = vrot.lane.b32.xlu0 %v1844_v25, %s1575_s28 }
 0x1dc   : > { %435 = vrot.lane.b32.xlu1 %v1856_v27, %s1574_s27 }
 0x1df   : > { %437 = vrot.lane.b32.xlu2 %v1861_v28, %s1574_s27 }
 0x1e1   : > { %v1124_v30 = vpop.permute.xlu2 %1123  ;;  %451 = vrot.lane.b32.xlu0 %v1864_v29, %s1574_s27 }
 0x1e2   : > { %v1904_v45 = vadd.f32 %v1124_v30, %v1783_v57 }
 0x1e4   : > { %491 = vrot.lane.b32.xlu1 %v1856_v27, %s1573_s26 }
 0x1e7   : > { %493 = vrot.lane.b32.xlu2 %v1861_v28, %s1573_s26 }
 0x1e9   : > { %v1108_v31 = vpop.permute.xlu2 %1107  ;;  %503 = vrot.lane.b32.xlu0 %v1864_v29, %s1575_s28 }
 0x1ea   : > { %v1889_v38 = vsub.f32 %v1783_v57, %v1108_v31 }
 0x1ef   : > { %431 = vrot.lane.b32.xlu2 %v1877_v33, %s1574_s27 }
 0x1f1   : > { %v636_v34 = vpop.permute.xlu2 %635 }
 0x1f2   : > { %v1901_v43 = vsub.f32 %v1785_v58, %v636_v34 }
 0x1f6   : > { %v634_v35 = vpop.permute.xlu1 %633 }
 0x1f7   : > { %v1882_v36 = vsub.f32 %v1781_v56, %v634_v35  ;;  %487 = vrot.lane.b32.xlu2 %v1877_v33, %s1573_s26 }
 0x1f9   : > { %v652_v37 = vpop.permute.xlu2 %651  ;;  %669 = vrot.lane.b32.xlu1 %v1882_v36, %s1574_s27 }
 0x1fa   : > { %v1913_v48 = vadd.f32 %v652_v37, %v1785_v58 }
 0x1fe   : > { %v650_v39 = vpop.permute.xlu1 %649 }
 0x1ff   : > { %v1892_v40 = vadd.f32 %v650_v39, %v1781_v56  ;;  %1199 = vrot.lane.b32.xlu2 %v1889_v38, %s1573_s26 }
 0x201   : > { %v1126_v41 = vpop.permute.xlu0 %1125  ;;  %v1128_v42 = vpop.permute.xlu2 %1127  ;;  %689 = vrot.lane.b32.xlu0 %v1892_v40, %s1574_s27  ;;  %741 = vrot.lane.b32.xlu1 %v1892_v40, %s1575_s28 }
 0x202   : > { %v1922_v52 = vadd.f32 %v1126_v41, %v1787_v59  ;;  %v1954_v6 = vadd.f32 %v1128_v42, %v1791_v61 }
 0x206   : > { %v638_v44 = vpop.permute.xlu1 %637 }
 0x207   : > { %671 = vrot.lane.b32.xlu2 %v1901_v43, %s1574_s27  ;;  %v1943_v2 = vsub.f32 %v1789_v60, %v638_v44 }
 0x209   : > { %v1110_v46 = vpop.permute.xlu0 %1109  ;;  %v640_v47 = vpop.permute.xlu2 %639  ;;  %725 = vrot.lane.b32.xlu0 %v1882_v36, %s1573_s26  ;;  %1215 = vrot.lane.b32.xlu1 %v1904_v45, %s1575_s28 }
 0x20a   : > { %v1934_v58 = vsub.f32 %v1787_v59, %v1110_v46  ;;  %v1957_v8 = vsub.f32 %v1793_v62, %v640_v47 }
 0x20e   : > { %v654_v49 = vpop.permute.xlu1 %653 }
 0x20f   : > { %743 = vrot.lane.b32.xlu2 %v1913_v48, %s1575_s28  ;;  %v1931_v56 = vadd.f32 %v654_v49, %v1789_v60 }
 0x211   : > { %v656_v50 = vpop.permute.xlu2 %655  ;;  %1163 = vrot.lane.b32.xlu0 %v1904_v45, %s1574_s27  ;;  %691 = vrot.lane.b32.xlu1 %v1913_v48, %s1574_s27  ;;  %v1112_v51 = vpop.permute.xlu0 %1111 }
 0x212   : > { %v1968_v12 = vsub.f32 %v1791_v61, %v1112_v51  ;;  %v1997_v22 = vadd.f32 %v656_v50, %v1793_v62 }
 0x216   : > { %v1114_v53 = vpop.permute.xlu1 %1113 }
 0x217   : > { %1217 = vrot.lane.b32.xlu2 %v1922_v52, %s1575_s28 }
 0x219   : > { %v887_v54 = vpop.permute.xlu2 %886  ;;  %1143 = vrot.lane.b32.xlu0 %v1889_v38, %s1574_s27  ;;  %727 = vrot.lane.b32.xlu1 %v1901_v43, %s1573_s26  ;;  %v1130_v55 = vpop.permute.xlu0 %1129 }
 0x21a   : > { %v1971_v13 = vadd.f32 %v1130_v55, %v1795_v63  ;;  %v2000_v24 = vadd.f32 %v887_v54, %v1797_v1 }
 0x21e   : > { %v873_v57 = vpop.permute.xlu1 %872 }
 0x21f   : > { %693 = vrot.lane.b32.xlu2 %v1931_v56, %s1574_s27  ;;  %v2011_v30 = vsub.f32 %v1801_v4, %v873_v57 }
 0x221   : > { %v875_v0 = vpop.permute.xlu2 %874  ;;  %1201 = vrot.lane.b32.xlu0 %v1934_v58, %s1573_s26  ;;  %1165 = vrot.lane.b32.xlu1 %v1922_v52, %s1574_s27  ;;  %v871_v3 = vpop.permute.xlu0 %870 }
 0x222   : > { %v2014_v62 = vsub.f32 %v1797_v1, %v871_v3  ;;  %v2031_v1 = vsub.f32 %v1806_v7, %v875_v0 }
 0x226   : > { %v891_v5 = vpop.permute.xlu1 %890 }
 0x227   : > { %729 = vrot.lane.b32.xlu2 %v1943_v2, %s1573_s26  ;;  %v2025_v35 = vadd.f32 %v891_v5, %v1806_v7 }
 0x229   : > { %v1947_v59 = vpop.permute.xlu2 %455  ;;  %745 = vrot.lane.b32.xlu0 %v1931_v56, %s1575_s28  ;;  %1145 = vrot.lane.b32.xlu1 %v1934_v58, %s1574_s27  ;;  %v889_v60 = vpop.permute.xlu0 %888 }
 0x22a   : > { %v1992_v19 = vadd.f32 %v889_v60, %v1801_v4  ;;  %v2028_v4 = vsub.f32 %v1795_v63, %v1114_v53  ;;  %v465_v53 = vmul.f32 %v1947_v59, %v1841_v23 }
 0x22c   : > { %2393 = vst [vmem:[#allocation5_spill] sm:$0xff] %v2028_v4 }
 0x22e   : > { %v454_v10 = vpop.permute.xlu1 %453 }
 0x22f   : > { %1219 = vrot.lane.b32.xlu2 %v1954_v6, %s1575_s28  ;;  %v464_v44 = vmul.f32 %v454_v10, %v1825_v16 }
 0x231   : > { %v1961_v11 = vpop.permute.xlu2 %507  ;;  %731 = vrot.lane.b32.xlu0 %v1957_v8, %s1573_s26  ;;  %673 = vrot.lane.b32.xlu1 %v1943_v2, %s1574_s27  ;;  %v1981_v15 = vpop.permute.xlu0 %433 }
 0x232   : > { %v517_v3 = vmul.f32 %v1961_v11, %v1856_v27 }
 0x236   : > { %v506_v17 = vpop.permute.xlu1 %505 }
 0x237   : > { %1203 = vrot.lane.b32.xlu2 %v1968_v12, %s1573_s26  ;;  %v516_v51 = vmul.f32 %v506_v17, %v1829_v18 }
 0x239   : > { %v1975_v14 = vpop.permute.xlu2 %437  ;;  %1221 = vrot.lane.b32.xlu0 %v1971_v13, %s1575_s28  ;;  %1167 = vrot.lane.b32.xlu1 %v1954_v6, %s1574_s27  ;;  %v1994_v20 = vpop.permute.xlu0 %489 }
 0x23e   : > { %v893_v21 = vpop.permute.xlu1 %892 }
 0x23f   : > { %675 = vrot.lane.b32.xlu2 %v1957_v8, %s1574_s27  ;;  %v2057_v46 = vadd.f32 %v893_v21, %v1811_v9 }
 0x241   : > { %v1985_v61 = vpop.permute.xlu2 %493  ;;  %1169 = vrot.lane.b32.xlu0 %v1971_v13, %s1574_s27  ;;  %1147 = vrot.lane.b32.xlu1 %v1968_v12, %s1574_s27 }
 0x243   : > { %v458_v31 = vpop.permute.xlu0 %457 }
 0x246   : > { %v877_v32 = vpop.permute.xlu1 %876 }
 0x247   : > { %928 = vrot.lane.b32.xlu2 %v1992_v19, %s1574_s27  ;;  %v2074_v0 = vsub.f32 %v1811_v9, %v877_v32 }
 0x249   : > { %v2004_v26 = vpop.permute.xlu2 %431  ;;  %978 = vrot.lane.b32.xlu0 %v2000_v24, %s1575_s28  ;;  %695 = vrot.lane.b32.xlu1 %v1997_v22, %s1574_s27 }
 0x24b   : > { %v510_v37 = vpop.permute.xlu0 %509 }
 0x24e   : > { %v2035_v39 = vpop.permute.xlu1 %435 }
 0x24f   : > { %908 = vrot.lane.b32.xlu2 %v2011_v30, %s1574_s27 }
 0x251   : > { %v2018_v34 = vpop.permute.xlu2 %487  ;;  %962 = vrot.lane.b32.xlu0 %v2014_v62, %s1573_s26  ;;  %747 = vrot.lane.b32.xlu1 %v1997_v22, %s1575_s28 }
 0x253   : > { %v2045_v63 = vpop.permute.xlu0 %451 }
 0x256   : > { %v2053_v42 = vpop.permute.xlu1 %491 }
 0x257   : > { %982 = vrot.lane.b32.xlu2 %v2025_v35, %s1575_s28 }
 0x259   : > { %v2037_v41 = vpop.permute.xlu2 %1199  ;;  %966 = vrot.lane.b32.xlu0 %v2031_v1, %s1573_s26  ;;  %1205 = vrot.lane.b32.xlu1 %v2028_v4, %s1573_s26 }
 0x25b   : > { %v504_v49 = vpop.permute.xlu0 %503 }
 0x25f   : > { %930 = vrot.lane.b32.xlu2 %v2025_v35, %s1574_s27 }
 0x261   : > { %v2047_v7 = vpop.permute.xlu2 %671  ;;  %910 = vrot.lane.b32.xlu0 %v2031_v1, %s1574_s27  ;;  %1149 = vrot.lane.b32.xlu1 %v2028_v4, %s1574_s27 }
 0x267   : > { %473 = vrot.lane.b32.xlu2 %v464_v44, %s1573_s26 }
 0x269   : > { %v744_v47 = vpop.permute.xlu2 %743  ;;  %926 = vrot.lane.b32.xlu1 %v2000_v24, %s1574_s27  ;;  %984 = vrot.lane.b32.xlu0 %v2057_v46, %s1575_s28 }
 0x26b   : > { %v2064_v50 = vpop.permute.xlu1 %669 }
 0x26f   : > { %525 = vrot.lane.b32.xlu2 %v516_v51, %s1572_s25 }
 0x271   : > { %v1218_v54 = vpop.permute.xlu2 %1217  ;;  %906 = vrot.lane.b32.xlu1 %v2014_v62, %s1574_s27  ;;  %475 = vrot.lane.b32.xlu0 %v465_v53, %s1573_s26 }
 0x273   : > { %v690_v55 = vpop.permute.xlu0 %689  ;;  %v742_v57 = vpop.permute.xlu1 %741 }
 0x274   : > { %v701_v21 = vmul.f32 %v690_v55, %v1892_v40  ;;  %v754_v55 = vmul.f32 %v744_v47, %v1901_v43 }
 0x277   : > { %968 = vrot.lane.b32.xlu2 %v2074_v0, %s1573_s26 }
 0x279   : > { %v694_v5 = vpop.permute.xlu2 %693  ;;  %980 = vrot.lane.b32.xlu1 %v1992_v19, %s1575_s28  ;;  %527 = vrot.lane.b32.xlu0 %v517_v3, %s1572_s25  ;;  %v753_v3 = vmul.f32 %v742_v57, %v1882_v36 }
 0x27b   : > { %v2083_v59 = vpop.permute.xlu0 %725  ;;  %v1216_v60 = vpop.permute.xlu1 %1215 }
 0x27c   : > { %v1227_v10 = vmul.f32 %v1216_v60, %v1889_v38  ;;  %v466_v60 = vmul.f32 %v458_v31, %v1844_v25 }
 0x27f   : > { %912 = vrot.lane.b32.xlu2 %v2074_v0, %s1574_s27 }
 0x281   : > { %v2088_v9 = vpop.permute.xlu2 %729  ;;  %964 = vrot.lane.b32.xlu1 %v2011_v30, %s1573_s26  ;;  %1235 = vrot.lane.b32.xlu0 %v1227_v10, %s1572_s25 }
 0x282   : > { %2394 = vst [vmem:[#allocation6_spill] sm:$0xff] %v2088_v9  ;;  %v518_v9 = vmul.f32 %v510_v37, %v1861_v28 }
 0x283   : > { %v1164_v11 = vpop.permute.xlu0 %1163  ;;  %v692_v17 = vpop.permute.xlu1 %691 }
 0x284   : > { %v702_v32 = vmul.f32 %v692_v17, %v1913_v48 }
 0x287   : > { %709 = vrot.lane.b32.xlu2 %v701_v21, %s1573_s26 }
 0x289   : > { %v1220_v44 = vpop.permute.xlu2 %1219  ;;  %932 = vrot.lane.b32.xlu1 %v2057_v46, %s1574_s27  ;;  %711 = vrot.lane.b32.xlu0 %v702_v32, %s1573_s26  ;;  %v1175_v32 = vmul.f32 %v1164_v11, %v1904_v45  ;;  %v463_v11 = vmul.f32 %v2045_v63, %v1864_v29 }
 0x28b   : > { %v2099_v51 = vpop.permute.xlu0 %1143  ;;  %v2101_v53 = vpop.permute.xlu1 %727 }
 0x28f   : > { %761 = vrot.lane.b32.xlu2 %v753_v3, %s1572_s25 }
 0x291   : > { %v2107_v10 = vpop.permute.xlu2 %1203  ;;  %477 = vrot.lane.b32.xlu1 %v466_v60, %s1573_s26  ;;  %763 = vrot.lane.b32.xlu0 %v754_v55, %s1572_s25  ;;  %v1229_v60 = vmul.f32 %v1220_v44, %v1968_v12 }
 0x292   : > { %2395 = vst [vmem:[#allocation7_spill] sm:$0xff] %v2107_v10 }
 0x293   : > { %v2111_v17 = vpop.permute.xlu0 %1201  ;;  %v1166_v21 = vpop.permute.xlu1 %1165 }
 0x294   : > { %v1176_v57 = vmul.f32 %v1166_v21, %v1922_v52 }
 0x297   : > { %1183 = vrot.lane.b32.xlu2 %v1175_v32, %s1573_s26 }
 0x299   : > { %v2117_v31 = vpop.permute.xlu2 %675  ;;  %529 = vrot.lane.b32.xlu1 %v518_v9, %s1572_s25  ;;  %1185 = vrot.lane.b32.xlu0 %v1176_v57, %s1573_s26  ;;  %v515_v9 = vmul.f32 %v504_v49, %v1877_v33 }
 0x29b   : > { %v746_v47 = vpop.permute.xlu0 %745  ;;  %v2121_v3 = vpop.permute.xlu1 %1145 }
 0x29f   : > { %1239 = vrot.lane.b32.xlu2 %v1229_v60, %s1572_s25 }
 0x2a1   : > { %v2127_v37 = vpop.permute.xlu2 %928  ;;  %471 = vrot.lane.b32.xlu1 %v463_v11, %s1573_s26  ;;  %v1228_v11 = vmul.f32 %v1218_v54, %v1934_v58 }
 0x2a3   : > { %v2130_v55 = vpop.permute.xlu0 %731  ;;  %v2132_v21 = vpop.permute.xlu1 %673 }
 0x2a4   : > { %2396 = vst [vmem:[#allocation8_spill] sm:$0xff] %v2130_v55 }
 0x2a9   : > { %v2135_v32 = vpop.permute.xlu2 %908  ;;  %523 = vrot.lane.b32.xlu1 %v515_v9, %s1572_s25 }
 0x2aa   : > { %2397 = vst [vmem:[#allocation9_spill] sm:$0xff] %v2135_v32 }
 0x2ab   : > { %v1222_v44 = vpop.permute.xlu0 %1221  ;;  %v1168_v57 = vpop.permute.xlu1 %1167 }
 0x2ac   : > { %v1230_v63 = vmul.f32 %v1222_v44, %v2028_v4  ;;  %v1177_v60 = vmul.f32 %v1168_v57, %v1954_v6  ;;  %v703_v44 = vmul.f32 %v694_v5, %v1931_v56 }
 0x2ae   : > { %1241 = vrot.lane.b32.xlu0 %v1230_v63, %s1572_s25  ;;  %1187 = vrot.lane.b32.xlu2 %v1177_v60, %s1573_s26 }
 0x2b1   : > { %v983_v10 = vpop.permute.xlu2 %982  ;;  %1237 = vrot.lane.b32.xlu1 %v1228_v11, %s1572_s25  ;;  %v755_v11 = vmul.f32 %v746_v47, %v1943_v2 }
 0x2b2   : > { %v992_v9 = vmul.f32 %v983_v10, %v2031_v1  ;;  %v444_v10 = vmul.f32 %v1981_v15, %v1829_v18 }
 0x2b3   : > { %v1170_v49 = vpop.permute.xlu0 %1169  ;;  %v2144_v55 = vpop.permute.xlu1 %1147 }
 0x2b6   : > { %1002 = vrot.lane.b32.xlu0 %v992_v9, %s1572_s25 }
 0x2b9   : > { %v931_v32 = vpop.permute.xlu2 %930  ;;  %713 = vrot.lane.b32.xlu1 %v703_v44, %s1573_s26 }
 0x2ba   : > { %v940_v60 = vmul.f32 %v931_v32, %v2025_v35 }
 0x2bb   : > { %v979_v57 = vpop.permute.xlu0 %978  ;;  %v696_v63 = vpop.permute.xlu1 %695 }
 0x2bc   : > { %v704_v54 = vmul.f32 %v696_v63, %v1997_v22  ;;  %v500_v63 = vmul.f32 %v1994_v20, %v1825_v16  ;;  %v1178_v20 = vmul.f32 %v1170_v49, %v1971_v13 }
 0x2be   : > { %950 = vrot.lane.b32.xlu0 %v940_v60, %s1573_s26  ;;  %715 = vrot.lane.b32.xlu2 %v704_v54, %s1573_s26 }
 0x2c1   : > { %v474_v9 = vpop.permute.xlu2 %473  ;;  %765 = vrot.lane.b32.xlu1 %v755_v11, %s1572_s25  ;;  %v990_v11 = vmul.f32 %v979_v57, %v2014_v62  ;;  %v681_v57 = vmul.f32 %v2064_v50, %v1882_v36  ;;  %v1155_v36 = vmul.f32 %v2099_v51, %v1889_v38  ;;  %v501_v51 = vmul.f32 %v2053_v42, %v1841_v23 }
 0x2c2   : > { %v2158_v5 = vadd.f32 %v474_v9, %v444_v10  ;;  %v1157_v42 = vmul.f32 %v2144_v55, %v1968_v12  ;;  %v443_v12 = vmul.f32 %v2004_v26, %v1877_v33  ;;  %v1212_v33 = vmul.f32 %v2111_v17, %v1922_v52 }
 0x2c3   : > { %v2160_v44 = vpop.permute.xlu0 %962  ;;  %v748_v4 = vpop.permute.xlu1 %747 }
 0x2c4   : > { %2398 = vst [vmem:[#allocation10_spill] sm:$0xff] %v2158_v5  ;;  %v756_v32 = vmul.f32 %v748_v4, %v1957_v8 }
 0x2c9   : > { %v526_v60 = vpop.permute.xlu2 %525  ;;  %767 = vrot.lane.b32.xlu1 %v756_v32, %s1572_s25 }
 0x2ca   : > { %v536_v47 = vsub.f32 %v500_v63, %v526_v60 }
 0x2cb   : > { %v2166_v54 = vpop.permute.xlu0 %966  ;;  %v2168_v18 = vpop.permute.xlu1 %1205 }
 0x2cc   : > { %2399 = vst [vmem:[#allocation11_spill] sm:$0xff] %v2168_v18  ;;  %v544_v15 = vmul.f32 %v536_v47, %v536_v47 }
 0x2ce   : > { %553 = vrot.lane.b32.xlu0 %v544_v15, %s1573_s26  ;;  %v445_v15 = vmul.f32 %v2035_v39, %v1856_v27 }
 0x2d1   : > { %v2172_v10 = vpop.permute.xlu2 %968  ;;  %998 = vrot.lane.b32.xlu1 %v990_v11, %s1572_s25 }
 0x2d2   : > { %2400 = vst [vmem:[#allocation12_spill] sm:$0xff] %v2172_v10 }
 0x2d3   : > { %v2175_v4 = vpop.permute.xlu0 %910  ;;  %v2177_v16 = vpop.permute.xlu1 %1149 }
 0x2d4   : > { %v920_v17 = vmul.f32 %v2175_v4, %v2031_v1  ;;  %v974_v1 = vmul.f32 %v2160_v44, %v2000_v24 }
 0x2d9   : > { %v2180_v9 = vpop.permute.xlu2 %912  ;;  %1189 = vrot.lane.b32.xlu1 %v1178_v20, %s1573_s26 }
 0x2da   : > { %2401 = vst [vmem:[#allocation13_spill] sm:$0xff] %v2180_v9 }
 0x2db   : > { %v985_v32 = vpop.permute.xlu0 %984  ;;  %v927_v63 = vpop.permute.xlu1 %926 }
 0x2dc   : > { %v938_v60 = vmul.f32 %v927_v63, %v2000_v24 }
 0x2e1   : > { %v710_v47 = vpop.permute.xlu2 %709  ;;  %946 = vrot.lane.b32.xlu1 %v938_v60, %s1573_s26 }
 0x2e2   : > { %v2189_v11 = vadd.f32 %v710_v47, %v681_v57  ;;  %v939_v57 = vmul.f32 %v2127_v37, %v1992_v19  ;;  %v682_v47 = vmul.f32 %v2047_v7, %v1901_v43  ;;  %v446_v43 = vmul.f32 %v1975_v14, %v1861_v28 }
 0x2e3   : > { %v476_v49 = vpop.permute.xlu0 %475  ;;  %v2191_v5 = vpop.permute.xlu1 %906  ;;  %v738_v7 = vmul.f32 %v2101_v53, %v1913_v48  ;;  %v502_v28 = vmul.f32 %v1985_v61, %v1844_v25  ;;  %v1156_v48 = vmul.f32 %v2121_v3, %v1934_v58  ;;  %v684_v25 = vmul.f32 %v2117_v31, %v1957_v8 }
 0x2e4   : > { %v2193_v9 = vadd.f32 %v476_v49, %v445_v15  ;;  %v993_v49 = vmul.f32 %v985_v32, %v2074_v0  ;;  %v499_v58 = vmul.f32 %v2018_v34, %v1864_v29  ;;  %v1211_v29 = vmul.f32 %v2037_v41, %v1904_v45  ;;  %v2402_v41 = vld [vmem:[#allocation6_spill] sm:$0xff] }
 0x2e9   : > { %v762_v20 = vpop.permute.xlu2 %761 }
 0x2eb   : > { %v528_v10 = vpop.permute.xlu0 %527  ;;  %v981_v18 = vpop.permute.xlu1 %980 }
 0x2ec   : > { %v991_v63 = vmul.f32 %v981_v18, %v2011_v30  ;;  %v537_v37 = vsub.f32 %v501_v51, %v528_v10 }
 0x2ee   : > { %1000 = vrot.lane.b32.xlu2 %v991_v63, %s1572_s25 }
 0x2f1   : > { %v1184_v50 = vpop.permute.xlu2 %1183 }
 0x2f2   : > { %v2199_v60 = vadd.f32 %v1184_v50, %v1155_v36 }
 0x2f3   : > { %v1236_v27 = vpop.permute.xlu0 %1235  ;;  %v2201_v39 = vpop.permute.xlu1 %964 }
 0x2f6   : > { %948 = vrot.lane.b32.xlu2 %v939_v57, %s1573_s26  ;;  %v545_v57 = vmul.f32 %v537_v37, %v537_v37 }
 0x2f9   : > { %v2216_v36 = vpop.permute.xlu2 %1239 }
 0x2fb   : > { %v712_v18 = vpop.permute.xlu0 %711  ;;  %v933_v15 = vpop.permute.xlu1 %932 }
 0x2fc   : > { %v2209_v63 = vadd.f32 %v712_v18, %v682_v47  ;;  %v941_v38 = vmul.f32 %v933_v15, %v2057_v46 }
 0x2fe   : > { %1004 = vrot.lane.b32.xlu2 %v993_v49, %s1572_s25  ;;  %952 = vrot.lane.b32.xlu1 %v941_v38, %s1573_s26  ;;  %s1321_s25 = sshll.u32 %s1317_s10, 4  ;;  %s1322_s25 = int_to_ptr.hbm [resolvable:$true] %s1321_s25 }
 0x2ff   : > { %s1522_s27 = sshra.s32 %s1322_s25, 4  ;;  %s1523_s27 = int_to_ptr.hbm [resolvable:$true] %s1522_s27 }
 0x300   : > { %s1524_s28 = scalar_lea.hbm %s1523_s27, 8  ;;  %p1529_p0 = scmp.lt.s32.totalorder %s1523_s27, %s2389_s3 }
 0x301   : > { %p1525_p11 = scmp.ne.s32.totalorder %s1523_s27, %s1524_s28 }
 0x303   : > { %v764_v32 = vpop.permute.xlu0 %763  ;;  %v478_v50 = vpop.permute.xlu1 %477  ;;  %p1526_p12 = pnand %p1525_p11, %p1634_p5 }
 0x304   : > { %v774_v47 = vsub.f32 %v738_v7, %v764_v32  ;;  %v2222_v18 = vadd.f32 %v478_v50, %v446_v43  ;;  %v737_v50 = vmul.f32 %v2083_v59, %v1892_v40  ;;  %v683_v40 = vmul.f32 %v2132_v21, %v1943_v2  ;;  %v2403_v2 = vld [vmem:[#allocation8_spill] sm:$0xff] }
 0x305   : > { %v1247_v59 = vsub.f32 %v1211_v29, %v1236_v27  ;;  %v740_v21 = vmul.f32 %v2403_v2, %v1997_v22  ;;  %p1527_p13 = pneg %p1526_p12 }
 0x306   : > { %v782_v23 = vmul.f32 %v774_v47, %v774_v47  ;;  %555 = vrot.lane.b32.xlu1 %v545_v57, %s1573_s26  ;;  %v773_v26 = vsub.f32 %v737_v50, %v762_v20 }
 0x307   : > { %v1255_v52 = vmul.f32 %v1247_v59, %v1247_v59 }
 0x308   : > { %791 = vrot.lane.b32.xlu0 %v782_v23, %s1573_s26  ;;  %v1188_v10 = vpop.permute.xlu2 %1187  ;;  %v781_v47 = vmul.f32 %v773_v26, %v773_v26 }
 0x309   : > { %v2228_v15 = vadd.f32 %v1188_v10, %v1157_v42 }
 0x30b   : > { %v1186_v14 = vpop.permute.xlu0 %1185  ;;  %v530_v53 = vpop.permute.xlu1 %529 }
 0x30c   : > { %v2234_v49 = vadd.f32 %v1186_v14, %v1156_v48  ;;  %v538_v38 = vsub.f32 %v502_v28, %v530_v53  ;;  %v739_v28 = vmul.f32 %v2402_v41, %v1931_v56  ;;  %v975_v56 = vmul.f32 %v2201_v39, %v1992_v19 }
 0x30e   : > { %v546_v51 = vmul.f32 %v538_v38, %v538_v38 }
 0x310   : > { %557 = vrot.lane.b32.xlu2 %v546_v51, %s1573_s26 }
 0x313   : > { %v472_v55 = vpop.permute.xlu1 %471 }
 0x314   : > { %v2239_v37 = vadd.f32 %v472_v55, %v443_v12 }
 0x318   : > { %v716_v61 = vpop.permute.xlu2 %715 }
 0x319   : > { %v2243_v43 = vadd.f32 %v716_v61, %v684_v25  ;;  %v2404_v25 = vld [vmem:[#allocation7_spill] sm:$0xff] }
 0x31a   : > { %v1213_v61 = vmul.f32 %v2404_v25, %v1954_v6  ;;  %v2406_v6 = vld [vmem:[#allocation9_spill] sm:$0xff] }
 0x31b   : > { %v524_v3 = vpop.permute.xlu1 %523  ;;  %v919_v39 = vmul.f32 %v2406_v6, %v2011_v30  ;;  %v2408_v30 = vld [vmem:[#allocation12_spill] sm:$0xff] }
 0x31c   : > { %v535_v7 = vsub.f32 %v499_v58, %v524_v3  ;;  %v2405_v3 = vld [vmem:[#allocation5_spill] sm:$0xff]  ;;  %v977_v29 = vmul.f32 %v2408_v30, %v2057_v46 }
 0x31e   : > { %v543_v32 = vmul.f32 %v535_v7, %v535_v7  ;;  %v1158_v7 = vmul.f32 %v2177_v16, %v2405_v3 }
 0x320   : > { %v1242_v57 = vpop.permute.xlu0 %1241  ;;  %551 = vrot.lane.b32.xlu2 %v543_v32, %s1573_s26  ;;  %v1249_v32 = vsub.f32 %v1213_v61, %v2216_v36  ;;  %v918_v36 = vmul.f32 %v2191_v5, %v2014_v62  ;;  %v2409_v62 = vld [vmem:[#allocation13_spill] sm:$0xff] }
 0x321   : > { %v921_v5 = vmul.f32 %v2409_v62, %v2074_v0  ;;  %v542_v0 = vmul.f32 %v2222_v18, %v2222_v18 }
 0x322   : > { %v1257_v19 = vmul.f32 %v1249_v32, %v1249_v32 }
 0x323   : > { %v1238_v8 = vpop.permute.xlu1 %1237 }
 0x324   : > { %v1248_v31 = vsub.f32 %v1212_v33, %v1238_v8  ;;  %v976_v33 = vmul.f32 %v2166_v54, %v2025_v35  ;;  %v2407_v35 = vld [vmem:[#allocation11_spill] sm:$0xff] }
 0x325   : > { %v1214_v54 = vmul.f32 %v2407_v35, %v1971_v13 }
 0x326   : > { %v1256_v23 = vmul.f32 %v1248_v31, %v1248_v31 }
 0x328   : > { %v1003_v34 = vpop.permute.xlu0 %1002  ;;  %789 = vrot.lane.b32.xlu2 %v781_v47, %s1573_s26  ;;  %1265 = vrot.lane.b32.xlu0 %v1256_v23, %s1573_s26 }
 0x329   : > { %v1012_v26 = vsub.f32 %v976_v33, %v1003_v34  ;;  %v1250_v34 = vsub.f32 %v1214_v54, %v1242_v57 }
 0x32b   : > { %v714_v42 = vpop.permute.xlu1 %713  ;;  %v1020_v31 = vmul.f32 %v1012_v26, %v1012_v26 }
 0x32c   : > { %v2258_v10 = vadd.f32 %v714_v42, %v683_v40  ;;  %v1258_v42 = vmul.f32 %v1250_v34, %v1250_v34 }
 0x330   : > { %v951_v20 = vpop.permute.xlu0 %950  ;;  %1263 = vrot.lane.b32.xlu2 %v1255_v52, %s1573_s26 }
 0x331   : > { %v2263_v45 = vadd.f32 %v951_v20, %v920_v17 }
 0x333   : > { %v766_v48 = vpop.permute.xlu1 %765 }
 0x334   : > { %v775_v14 = vsub.f32 %v739_v28, %v766_v48  ;;  %v2410_v28 = vld [vmem:[#allocation10_spill] sm:$0xff]  ;;  %v541_v48 = vmul.f32 %v2193_v9, %v2193_v9  ;;  %v778_v9 = vmul.f32 %v2209_v63, %v2209_v63  ;;  %v1251_v63 = vmul.f32 %v2199_v60, %v2199_v60 }
 0x335   : > { %v540_v46 = vmul.f32 %v2410_v28, %v2410_v28  ;;  %v779_v60 = vmul.f32 %v2258_v10, %v2258_v10 }
 0x336   : > { %v783_v53 = vmul.f32 %v775_v14, %v775_v14  ;;  %v539_v14 = vmul.f32 %v2239_v37, %v2239_v37 }
 0x338   : > { %793 = vrot.lane.b32.xlu1 %v783_v53, %s1573_s26 }
 0x33b   : > { %v768_v27 = vpop.permute.xlu1 %767 }
 0x33c   : > { %v776_v38 = vsub.f32 %v740_v21, %v768_v27 }
 0x33e   : > { %v784_v51 = vmul.f32 %v776_v38, %v776_v38 }
 0x340   : > { %795 = vrot.lane.b32.xlu2 %v784_v51, %s1573_s26  ;;  %v554_v41 = vpop.permute.xlu0 %553 }
 0x341   : > { %v564_v53 = vadd.f32 %v554_v41, %v540_v46  ;;  %v1016_v46 = vmul.f32 %v2263_v45, %v2263_v45 }
 0x343   : > { %v999_v4 = vpop.permute.xlu1 %998  ;;  %v568_v38 = vsel %vm321_vm3, %v564_v53, 0.0 }
 0x344   : > { %v1010_v12 = vsub.f32 %v974_v1, %v999_v4 }
 0x346   : > { %v1018_v55 = vmul.f32 %v1010_v12, %v1010_v12 }
 0x348   : > { %v1001_v58 = vpop.permute.xlu2 %1000  ;;  %1026 = vrot.lane.b32.xlu2 %v1018_v55, %s1573_s26 }
 0x349   : > { %v1011_v22 = vsub.f32 %v975_v56, %v1001_v58  ;;  %v777_v56 = vmul.f32 %v2189_v11, %v2189_v11 }
 0x34b   : > { %v1019_v50 = vmul.f32 %v1011_v22, %v1011_v22  ;;  %v1190_v24 = vpop.permute.xlu1 %1189 }
 0x34c   : > { %v2281_v44 = vadd.f32 %v1190_v24, %v1158_v7  ;;  %v1252_v24 = vmul.f32 %v2234_v49, %v2234_v49 }
 0x34d   : > { %1028 = vrot.lane.b32.xlu0 %v1019_v50, %s1573_s26 }
 0x350   : > { %v949_v8 = vpop.permute.xlu2 %948  ;;  %1267 = vrot.lane.b32.xlu2 %v1257_v19, %s1573_s26 }
 0x351   : > { %v2289_v16 = vadd.f32 %v949_v8, %v919_v39 }
 0x353   : > { %v947_v47 = vpop.permute.xlu1 %946  ;;  %v1015_v10 = vmul.f32 %v2289_v16, %v2289_v16 }
 0x354   : > { %v2293_v23 = vadd.f32 %v947_v47, %v918_v36  ;;  %v780_v47 = vmul.f32 %v2243_v43, %v2243_v43 }
 0x355   : > { %1030 = vrot.lane.b32.xlu0 %v1020_v31, %s1573_s26  ;;  %v1253_v31 = vmul.f32 %v2228_v15, %v2228_v15 }
 0x356   : > { %v1014_v43 = vmul.f32 %v2293_v23, %v2293_v23  ;;  %v1254_v23 = vmul.f32 %v2281_v44, %v2281_v44 }
 0x358   : > { %v1005_v40 = vpop.permute.xlu2 %1004 }
 0x359   : > { %v1013_v59 = vsub.f32 %v977_v29, %v1005_v40 }
 0x35b   : > { %v1021_v52 = vmul.f32 %v1013_v59, %v1013_v59 }
 0x35d   : > { %1269 = vrot.lane.b32.xlu0 %v1258_v42, %s1573_s26  ;;  %1032 = vrot.lane.b32.xlu1 %v1021_v52, %s1573_s26 }
 0x36a   : > { %v558_v13 = vpop.permute.xlu2 %557 }
 0x36b   : > { %v566_v51 = vadd.f32 %v558_v13, %v542_v0 }
 0x36d   : > { %v573_v25 = vsel %vm572_vm4, %v566_v51, 0.0 }
 0x370   : > { %v953_v17 = vpop.permute.xlu1 %952 }
 0x371   : > { %v2304_v20 = vadd.f32 %v953_v17, %v921_v5 }
 0x373   : > { %v1017_v16 = vmul.f32 %v2304_v20, %v2304_v20 }
 0x378   : > { %v556_v57 = vpop.permute.xlu1 %555 }
 0x379   : > { %v565_v21 = vadd.f32 %v556_v57, %v541_v48 }
 0x37a   : > { %v552_v2 = vpop.permute.xlu2 %551  ;;  %v792_v4 = vpop.permute.xlu0 %791 }
 0x37b   : > { %v563_v27 = vadd.f32 %v552_v2, %v539_v14  ;;  %v570_v37 = vsel %vm321_vm3, %v565_v21, 0.0  ;;  %v802_v18 = vadd.f32 %v792_v4, %v778_v9 }
 0x37d   : > { %v567_v1 = vsel %vm321_vm3, %v563_v27, 0.0  ;;  %v806_v3 = vsel %vm321_vm3, %v802_v18, 0.0 }
 0x37e   : > { %v569_v12 = vadd.f32 %v568_v38, %v567_v1 }
 0x380   : > { %v571_v55 = vadd.f32 %v570_v37, %v569_v12 }
 0x382   : > { %v790_v61 = vpop.permute.xlu2 %789  ;;  %v574_v58 = vadd.f32 %v573_v25, %v571_v55 }
 0x383   : > { %v801_v22 = vadd.f32 %v790_v61, %v777_v56 }
 0x385   : > { %v805_v7 = vsel %vm321_vm3, %v801_v22, 0.0 }
 0x386   : > { %v807_v32 = vadd.f32 %v806_v3, %v805_v7 }
 0x387   : > { %575 = vadd.xlane.f32.xlu0 %v574_v58 }
 0x38a   : > { %v1264_v50 = vpop.permute.xlu2 %1263 }
 0x38b   : > { %v1275_v11 = vadd.f32 %v1264_v50, %v1251_v63 }
 0x38d   : > { %v1279_v39 = vsel %vm321_vm3, %v1275_v11, 0.0 }
 0x39a   : > { %v1266_v33 = vpop.permute.xlu0 %1265  ;;  %v796_v19 = vpop.permute.xlu2 %795 }
 0x39b   : > { %v1276_v6 = vadd.f32 %v1266_v33, %v1252_v24  ;;  %v804_v54 = vadd.f32 %v796_v19, %v780_v47  ;;  %v1296_v47 = vlaneseq }
 0x39d   : > { %v1280_v26 = vsel %vm321_vm3, %v1276_v6, 0.0  ;;  %v810_v52 = vsel %vm572_vm4, %v804_v54, 0.0 }
 0x39e   : > { %v1281_v8 = vadd.f32 %v1280_v26, %v1279_v39 }
 0x3a2   : > { %v1027_v36 = vpop.permute.xlu2 %1026 }
 0x3a3   : > { %v1038_v62 = vadd.f32 %v1027_v36, %v1014_v43 }
 0x3a5   : > { %v1042_v13 = vsel %vm321_vm3, %v1038_v62, 0.0 }
 0x3aa   : > { %v1268_v49 = vpop.permute.xlu2 %1267  ;;  %v794_v35 = vpop.permute.xlu1 %793 }
 0x3ab   : > { %v1277_v30 = vadd.f32 %v1268_v49, %v1253_v31  ;;  %v803_v29 = vadd.f32 %v794_v35, %v779_v60  ;;  %v1297_v60 = vshrl.u32 %v1296_v47, 7  ;;  %v1299_v49 = vand.u32 127, %v1296_v47 }
 0x3ad   : > { %v1282_v34 = vsel %vm321_vm3, %v1277_v30, 0.0  ;;  %v808_v40 = vsel %vm321_vm3, %v803_v29, 0.0  ;;  %vm1300_vm5 = vcmp.eq.s32.totalorder %v1297_v60, 0  ;;  %vm1301_vm6 = vcmp.eq.s32.totalorder %v1299_v49, 0 }
 0x3ae   : > { %v809_v59 = vadd.f32 %v808_v40, %v807_v32  ;;  %v1283_v42 = vadd.f32 %v1282_v34, %v1281_v8  ;;  %vm1302_vm7 = vmand %vm1300_vm5, %vm1301_vm6 }
 0x3b0   : > { %v811_v15 = vadd.f32 %v810_v52, %v809_v59 }
 0x3b2   : > { %812 = vadd.xlane.f32.xlu1 %v811_v15 }
 0x3bf   : > { %v1029_v5 = vpop.permute.xlu0 %1028 }
 0x3c0   : > { %v1039_v17 = vadd.f32 %v1029_v5, %v1015_v10 }
 0x3c2   : > { %v1043_v41 = vsel %vm321_vm3, %v1039_v17, 0.0 }
 0x3c3   : > { %v1044_v28 = vadd.f32 %v1043_v41, %v1042_v13 }
 0x3c7   : > { %v1031_v57 = vpop.permute.xlu0 %1030 }
 0x3c8   : > { %v1040_v48 = vadd.f32 %v1031_v57, %v1016_v46 }
 0x3ca   : > { %v1045_v14 = vsel %vm321_vm3, %v1040_v48, 0.0 }
 0x3cb   : > { %v1046_v53 = vadd.f32 %v1045_v14, %v1044_v28 }
 0x3cf   : > { %v1270_v2 = vpop.permute.xlu0 %1269  ;;  %v1033_v0 = vpop.permute.xlu1 %1032 }
 0x3d0   : > { %v1278_v21 = vadd.f32 %v1270_v2, %v1254_v23  ;;  %v1041_v27 = vadd.f32 %v1033_v0, %v1017_v16 }
 0x3d2   : > { %v1047_v38 = vsel %vm572_vm4, %v1041_v27, 0.0  ;;  %v1284_v51 = vsel %vm572_vm4, %v1278_v21, 0.0 }
 0x3d3   : > { %v1048_v45 = vadd.f32 %v1047_v38, %v1046_v53  ;;  %v1285_v1 = vadd.f32 %v1284_v51, %v1283_v42 }
 0x3d5   : > { %1286 = vadd.xlane.f32.xlu0 %v1285_v1  ;;  %1049 = vadd.xlane.f32.xlu2 %v1048_v45 }
 0x3fa   : > { %v576_v4 = vpop.xlane.xlu0 %575 }
 0x3fb   : > { %v577_v12 = vrot.slane %v576_v4, 4 }
 0x3fd   : > { %v578_v9 = vadd.f32 %v577_v12, %v576_v4 }
 0x3ff   : > { %v579_v37 = vrot.slane %v578_v9, 2 }
 0x401   : > { %v580_v44 = vadd.f32 %v579_v37, %v578_v9 }
 0x403   : > { %v581_v55 = vrot.slane %v580_v44, 1 }
 0x405   : > { %v582_v56 = vadd.f32 %v581_v55, %v580_v44 }
 0x407   : > { %1457 = vpush %v582_v56 }
 0x425   : > { %v813_v20 = vpop.xlane.xlu1 %812 }
 0x426   : > { %v814_v18 = vrot.slane %v813_v20, 4 }
 0x428   : > { %v815_v25 = vadd.f32 %v814_v18, %v813_v20 }
 0x42a   : > { %v816_v61 = vrot.slane %v815_v25, 2 }
 0x42c   : > { %v817_v58 = vadd.f32 %v816_v61, %v815_v25 }
 0x42e   : > { %v818_v22 = vrot.slane %v817_v58, 1 }
 0x430   : > { %v819_v3 = vadd.f32 %v818_v22, %v817_v58 }
 0x432   : > { %1459 = vpush %v819_v3 }
 0x438   : > { %s1458_s30 = spop %1457 }
 0x448   : > { %v1287_v7 = vpop.xlane.xlu0 %1286  ;;  %v1050_v32 = vpop.xlane.xlu2 %1049 }
 0x449   : > { %v1288_v50 = vrot.slane %v1287_v7, 4  ;;  %v1051_v63 = vrot.slane %v1050_v32, 4 }
 0x44b   : > { %v1289_v24 = vadd.f32 %v1288_v50, %v1287_v7  ;;  %v1052_v11 = vadd.f32 %v1051_v63, %v1050_v32 }
 0x44d   : > { %v1290_v33 = vrot.slane %v1289_v24, 2  ;;  %v1053_v19 = vrot.slane %v1052_v11, 2 }
 0x44f   : > { %v1291_v6 = vadd.f32 %v1290_v33, %v1289_v24  ;;  %v1054_v39 = vadd.f32 %v1053_v19, %v1052_v11 }
 0x451   : > { %v1055_v26 = vrot.slane %v1054_v39, 1  ;;  %v1292_v8 = vrot.slane %v1291_v6, 1 }
 0x453   : > { %v1056_v36 = vadd.f32 %v1055_v26, %v1054_v39  ;;  %v1293_v31 = vadd.f32 %v1292_v8, %v1291_v6 }
 0x455   : > { %1461 = vpush %v1056_v36 }
 0x456   : > { %1463 = vpush %v1293_v31 }
 0x463   : > { %s1460_s5 = spop %1459 }
 0x464   : > { %s821_s7 = sadd.f32 %s1460_s5, %s1458_s30  ;;  %s1528_s5 = scalar_lea.hbm %s2389_s3, 16 }
 0x465   : > { %p1530_p1 = scmp.lt.s32.totalorder %s1528_s5, %s1524_s28 }
 0x467   : > { %p1531_p2 = por %p1530_p1, %p1529_p0 }
 0x469   : > { %p1532_p3 = pnand %p1531_p2, %p1527_p13 }
 0x486   : > { %s1462_s11 = spop %1461 }
 0x487   : > { %s1058_s17 = sadd.f32 %s1462_s11, %s821_s7  ;;  %s1464_s24 = spop %1463 }
 0x489   : > { %s1295_s26 = sadd.f32 %s1464_s24, %s1058_s17 }
 0x48b   : > { %v1303_v35 = vstv %s1295_s26 }
 0x48c   : > { %v1304_v54 = vsel %vm1302_vm7, %v1303_v35, 0.0 }
 0x48d   : > { %1305 = vst [vmem:[%s164_s19] sm:$0xff] %v1304_v54 }
 0x48e   : > { %1535 = shalt.err (!%p1532_p3)
}
 0x48f   : > { %1465 = dma.vmem_to_hbm [thread:$0]  (%p1634_p5), %s1320_s20, 128, %s1322_s25, %s1307_s16  }
 0x490 PF: > { %p1471_p4 = scmp.ge.s32.totalorder %s1570_s15, 2  ;;  %s1333_s29 = sand.u32 1, %s1558_s12  }
 0x491   : > { %s1334_s8 = scalar_lea.sflag [#allocation3], %s1333_s29 }
 0x492   : > { %p1468_p7 = pnand %p1471_p4, %p1638_p6 }
 0x494   : > { %p1469_p8 = pneg %p1468_p7 }
 0x496   : > { %1553 = dma.done.wait (%p1469_p8), %s1334_s8, 128  }
 0x497   : > { %1555 = vsyncadd (%p1469_p8), %s1334_s8, 4294967168  ;;  %p13_p9 = scmp.ge.s32.totalorder %s1621_s18, 4   ;;  %s2411_s12 = smov %s1562_s13 }
 0x498   : > { %s2412_s13 = smov %s1566_s14  ;;  %s2413_s14 = smov %s1632_s21 }
 0x499   : > { %s2414_s15 = smov %s1621_s18  ;;  %15 = sbr.rel (!%p13_p9) target bundleno = 3 (0x3), region = 67 }
 0x49e   :  { %1340 = vsyncpa [#allocation3], 1 }
 0x49f   :  { %1342 = vsyncpa [#allocation3 + $0x1], 1 }

</bundles_post_ra>
